<compile_context>
chip_gen: v6e
topology: v6e:2x2x1
jax: 0.10.0
libtpu: 0.0.40
codegen_flags: <defaults>
</compile_context>

<pallas_src>
import functools
import math

import jax
import jax.numpy as jnp
from jax.experimental import pallas as pl
from jax.experimental.pallas import tpu as pltpu

LANE = 128     # lane width / alignment for feature dims


def _round_up(x, m):
    return ((x + m - 1) // m) * m


def _choose_batch_tiling(M):
    """Pick (tile_m, padded_M) per the perf guidance."""
    if M <= 128:
        tile_m = _round_up(M, 8)          # no 16x row padding for tiny batches
        return tile_m, tile_m
    if M <= 512:
        tile_m = 128                      # 2..4 grid steps
    elif M <= 1024:
        tile_m = 256                      # 2..4 grid steps
    else:
        tile_m = 512                      # >= 2 grid steps for M > 1024
    return tile_m, _round_up(M, tile_m)


# ----------------------------------------------------------------------------
# Fused Pallas kernel:  out = tanh(...LeakyReLU(z @ W1 + b1)... @ Wn + bn)
# ----------------------------------------------------------------------------
def _fused_mlp_kernel(*refs, n_layers):
    # refs = (z_ref, w1_ref, b1_ref, ..., wn_ref, bn_ref, o_ref)
    z_ref = refs[0]
    o_ref = refs[-1]
    wb = refs[1:-1]

    h = z_ref[...]                                   # (TILE_M, K0) bf16
    for i in range(n_layers):
        w = wb[2 * i][...]                           # (K, N) bf16
        b = wb[2 * i + 1][...]                       # (1, N) f32
        # bf16 MXU inputs, f32 accumulation.
        y = jnp.dot(h, w, preferred_element_type=jnp.float32)
        y = y + b                                    # f32 bias add (VPU)
        if i == n_layers - 1:
            o_ref[...] = jnp.tanh(y).astype(o_ref.dtype)   # f32 tanh (EUP)
        else:
            # LeakyReLU(0.2) == max(y, 0.2*y); store bf16 for the next dot.
            h = jnp.maximum(y, jnp.float32(0.2) * y).astype(jnp.bfloat16)


def generator_forward(params, z, out_dim):
    """Fused generator forward.

    params : list of (W (K,N) bf16, b (N,) f32), already lane-padded.
    z      : (batch, latent_dim) f32.
    returns: (batch, out_dim) f32 in [-1, 1].
    """
    M, K = z.shape
    n_layers = len(params)
    K0p = params[0][0].shape[0]          # padded latent dim (multiple of 128)
    Np = params[-1][0].shape[1]          # padded output dim (multiple of 128)

    tile_m, Mp = _choose_batch_tiling(M)

    # Zero-pad batch rows / latent cols (no-op math), cast once to bf16.
    zp = jnp.zeros((Mp, K0p), jnp.float32).at[:M, :K].set(z)
    zp = zp.astype(jnp.bfloat16)

    in_specs = [pl.BlockSpec((tile_m, K0p), lambda i: (i, 0))]
    flat_inputs = [zp]
    for (w, b) in params:
        Kw, Nw = w.shape
        # Weights / biases: full-array VMEM blocks, same block for every
        # grid step (Pallas keeps them resident across the batch loop).
        in_specs.append(pl.BlockSpec((Kw, Nw), lambda i: (0, 0)))
        in_specs.append(pl.BlockSpec((1, Nw), lambda i: (0, 0)))
        flat_inputs.append(w)
        flat_inputs.append(b.reshape(1, Nw))

    cp_kwargs = dict(dimension_semantics=("parallel",))   # shard tiles on v7x
    if tile_m >= 512:
        # Headroom for double-buffered z/out tiles + widest spilled activation.
        cp_kwargs["vmem_limit_bytes"] = 64 * 1024 * 1024

    out = pl.pallas_call(
        functools.partial(_fused_mlp_kernel, n_layers=n_layers),
        out_shape=jax.ShapeDtypeStruct((Mp, Np), jnp.float32),
        grid=(Mp // tile_m,),
        in_specs=in_specs,
        out_specs=pl.BlockSpec((tile_m, Np), lambda i: (i, 0)),
        compiler_params=pltpu.CompilerParams(**cp_kwargs),
    )(*flat_inputs)
    return out[:M, :out_dim]


# ----------------------------------------------------------------------------
# Parameters (mirrors the PyTorch module; nn.Linear default init)
# ----------------------------------------------------------------------------
def make_generator_params(key, input_size, latent_dim, layers):
    hidden = 256
    if layers == 2:
        dims = [latent_dim, hidden, input_size]
    elif layers == 3:
        dims = [latent_dim, hidden, hidden * 2, input_size]
    else:  # layers == 4 (default branch of the PyTorch forward)
        dims = [latent_dim, hidden, hidden * 2, hidden * 4, input_size]

    params = []
    keys = jax.random.split(key, len(dims) - 1)
    last = len(dims) - 2
    for idx, (k, din, dout) in enumerate(zip(keys, dims[:-1], dims[1:])):
        kw, kb = jax.random.split(k)
        bound = 1.0 / math.sqrt(din)
        # Stored transposed to (in, out) so the kernel computes x @ W + b.
        w = jax.random.uniform(kw, (din, dout), jnp.float32,
                               minval=-bound, maxval=bound)
        b = jax.random.uniform(kb, (dout,), jnp.float32,
                               minval=-bound, maxval=bound)
        # Lane-align: pad first-layer K and last-layer N to multiples of 128.
        din_p = _round_up(din, LANE) if idx == 0 else din
        dout_p = _round_up(dout, LANE) if idx == last else dout
        wp = jnp.zeros((din_p, dout_p), jnp.float32).at[:din, :dout].set(w)
        bp = jnp.zeros((dout_p,), jnp.float32).at[:dout].set(b)
        # NOTE: bf16 weights (with f32 MXU accumulation) differ from a pure
        # f32 PyTorch Generator at the ~1e-2 level; this is intentional.
        params.append((wp.astype(jnp.bfloat16), bp))
    return params


def generator_reference(params, z, out_dim):
    """Pure-JAX reference with the same numerics (bf16 MXU inputs / bf16
    inter-layer activations, f32 accumulation and activation math)."""
    K0p = params[0][0].shape[0]
    h = jnp.zeros((z.shape[0], K0p), jnp.float32).at[:, :z.shape[1]].set(z)
    h = h.astype(jnp.bfloat16)
    n = len(params)
    for i, (w, b) in enumerate(params):
        y = jnp.dot(h, w, preferred_element_type=jnp.float32) + b[None, :]
        if i == n - 1:
            h = jnp.tanh(y)
        else:
            h = jnp.maximum(y, 0.2 * y).astype(jnp.bfloat16)
    return h[:, :out_dim]


# ----------------------------------------------------------------------------
if __name__ == "__main__":
    batch = 8
    latent_dim = 64
    input_size = 256       # small synthetic "image" size (MNIST would be 784)
    layers = 4             # exercise the deepest branch (model_4)

    key = jax.random.PRNGKey(0)
    kp, kz = jax.random.split(key)
    params = make_generator_params(kp, input_size, latent_dim, layers)
    z = jax.random.normal(kz, (batch, latent_dim), jnp.float32)

    out = generator_forward(params, z, input_size)
    out = jax.block_until_ready(out)

    assert out.shape == (batch, input_size)
    assert out.dtype == jnp.float32
    # Tanh output range sanity check.
    assert bool(jnp.all(jnp.abs(out) <= 1.0))
    # Numerical check against a pure-JAX reference with identical casting.
    ref = jax.block_until_ready(generator_reference(params, z, input_size))
    assert bool(jnp.all(jnp.abs(out - ref) <= 2e-3))

    print("KERNEL_OK")
</pallas_src>

<mosaic_0001>
module attributes {stable_mosaic.version = 11 : i64} {
  func.func @_fused_mlp_kernel(%arg0: i32, %arg1: memref<8x128xbf16, #tpu.memory_space<vmem>>, %arg2: memref<128x256xbf16, #tpu.memory_space<vmem>>, %arg3: memref<1x256xf32, #tpu.memory_space<vmem>>, %arg4: memref<256x512xbf16, #tpu.memory_space<vmem>>, %arg5: memref<1x512xf32, #tpu.memory_space<vmem>>, %arg6: memref<512x1024xbf16, #tpu.memory_space<vmem>>, %arg7: memref<1x1024xf32, #tpu.memory_space<vmem>>, %arg8: memref<1024x256xbf16, #tpu.memory_space<vmem>>, %arg9: memref<1x256xf32, #tpu.memory_space<vmem>>, %arg10: memref<8x256xf32, #tpu.memory_space<vmem>>) attributes {dimension_semantics = [#tpu.dimension_semantics<parallel>], iteration_bounds = array<i64: 1>, scalar_prefetch = 0 : i64, scratch_operands = 0 : i64, tpu.core_type = #tpu.core_type<tc>, window_params = [{transform_indices = @transform_0, window_bounds = array<i64: 8, 128>}, {pipeline_mode = #tpu.pipeline_mode<synchronous>, transform_indices = @transform_1, window_bounds = array<i64: 128, 256>}, {pipeline_mode = #tpu.pipeline_mode<synchronous>, transform_indices = @transform_2, window_bounds = array<i64: 1, 256>}, {pipeline_mode = #tpu.pipeline_mode<synchronous>, transform_indices = @transform_3, window_bounds = array<i64: 256, 512>}, {pipeline_mode = #tpu.pipeline_mode<synchronous>, transform_indices = @transform_4, window_bounds = array<i64: 1, 512>}, {pipeline_mode = #tpu.pipeline_mode<synchronous>, transform_indices = @transform_5, window_bounds = array<i64: 512, 1024>}, {pipeline_mode = #tpu.pipeline_mode<synchronous>, transform_indices = @transform_6, window_bounds = array<i64: 1, 1024>}, {pipeline_mode = #tpu.pipeline_mode<synchronous>, transform_indices = @transform_7, window_bounds = array<i64: 1024, 256>}, {pipeline_mode = #tpu.pipeline_mode<synchronous>, transform_indices = @transform_8, window_bounds = array<i64: 1, 256>}, {transform_indices = @transform_9, window_bounds = array<i64: 8, 256>}]} {
    %c0 = arith.constant 0 : index
    %c0_0 = arith.constant 0 : index
    %0 = vector.load %arg1[%c0, %c0_0] : memref<8x128xbf16, #tpu.memory_space<vmem>>, vector<8x128xbf16>
    %c0_1 = arith.constant 0 : index
    %c0_2 = arith.constant 0 : index
    %1 = vector.load %arg2[%c0_1, %c0_2] : memref<128x256xbf16, #tpu.memory_space<vmem>>, vector<128x256xbf16>
    %c0_3 = arith.constant 0 : index
    %c0_4 = arith.constant 0 : index
    %2 = vector.load %arg3[%c0_3, %c0_4] : memref<1x256xf32, #tpu.memory_space<vmem>>, vector<1x256xf32>
    %cst = arith.constant dense<0.000000e+00> : vector<8x256xf32>
    %3 = tpu.matmul %0, %1, %cst {dimension_numbers = #tpu.dot_dimension_numbers<[1], [0], [0], [1], [0, 0, 1, 1], [], []>} : vector<8x128xbf16>, vector<128x256xbf16>, vector<8x256xf32> -> vector<8x256xf32>
    %4 = vector.broadcast %2 : vector<1x256xf32> to vector<8x256xf32>
    %5 = arith.addf %3, %4 : vector<8x256xf32>
    %cst_5 = arith.constant 2.000000e-01 : f32
    %6 = vector.broadcast %cst_5 : f32 to vector<8x256xf32>
    %7 = arith.mulf %6, %5 : vector<8x256xf32>
    %8 = arith.maximumf %5, %7 : vector<8x256xf32>
    %9 = arith.truncf %8 : vector<8x256xf32> to vector<8x256xbf16>
    %c0_6 = arith.constant 0 : index
    %c0_7 = arith.constant 0 : index
    %10 = vector.load %arg4[%c0_6, %c0_7] : memref<256x512xbf16, #tpu.memory_space<vmem>>, vector<256x512xbf16>
    %c0_8 = arith.constant 0 : index
    %c0_9 = arith.constant 0 : index
    %11 = vector.load %arg5[%c0_8, %c0_9] : memref<1x512xf32, #tpu.memory_space<vmem>>, vector<1x512xf32>
    %cst_10 = arith.constant dense<0.000000e+00> : vector<8x512xf32>
    %12 = tpu.matmul %9, %10, %cst_10 {dimension_numbers = #tpu.dot_dimension_numbers<[1], [0], [0], [1], [0, 0, 1, 1], [], []>} : vector<8x256xbf16>, vector<256x512xbf16>, vector<8x512xf32> -> vector<8x512xf32>
    %13 = vector.broadcast %11 : vector<1x512xf32> to vector<8x512xf32>
    %14 = arith.addf %12, %13 : vector<8x512xf32>
    %cst_11 = arith.constant 2.000000e-01 : f32
    %15 = vector.broadcast %cst_11 : f32 to vector<8x512xf32>
    %16 = arith.mulf %15, %14 : vector<8x512xf32>
    %17 = arith.maximumf %14, %16 : vector<8x512xf32>
    %18 = arith.truncf %17 : vector<8x512xf32> to vector<8x512xbf16>
    %c0_12 = arith.constant 0 : index
    %c0_13 = arith.constant 0 : index
    %19 = vector.load %arg6[%c0_12, %c0_13] : memref<512x1024xbf16, #tpu.memory_space<vmem>>, vector<512x1024xbf16>
    %c0_14 = arith.constant 0 : index
    %c0_15 = arith.constant 0 : index
    %20 = vector.load %arg7[%c0_14, %c0_15] : memref<1x1024xf32, #tpu.memory_space<vmem>>, vector<1x1024xf32>
    %cst_16 = arith.constant dense<0.000000e+00> : vector<8x1024xf32>
    %21 = tpu.matmul %18, %19, %cst_16 {dimension_numbers = #tpu.dot_dimension_numbers<[1], [0], [0], [1], [0, 0, 1, 1], [], []>} : vector<8x512xbf16>, vector<512x1024xbf16>, vector<8x1024xf32> -> vector<8x1024xf32>
    %22 = vector.broadcast %20 : vector<1x1024xf32> to vector<8x1024xf32>
    %23 = arith.addf %21, %22 : vector<8x1024xf32>
    %cst_17 = arith.constant 2.000000e-01 : f32
    %24 = vector.broadcast %cst_17 : f32 to vector<8x1024xf32>
    %25 = arith.mulf %24, %23 : vector<8x1024xf32>
    %26 = arith.maximumf %23, %25 : vector<8x1024xf32>
    %27 = arith.truncf %26 : vector<8x1024xf32> to vector<8x1024xbf16>
    %c0_18 = arith.constant 0 : index
    %c0_19 = arith.constant 0 : index
    %28 = vector.load %arg8[%c0_18, %c0_19] : memref<1024x256xbf16, #tpu.memory_space<vmem>>, vector<1024x256xbf16>
    %c0_20 = arith.constant 0 : index
    %c0_21 = arith.constant 0 : index
    %29 = vector.load %arg9[%c0_20, %c0_21] : memref<1x256xf32, #tpu.memory_space<vmem>>, vector<1x256xf32>
    %cst_22 = arith.constant dense<0.000000e+00> : vector<8x256xf32>
    %30 = tpu.matmul %27, %28, %cst_22 {dimension_numbers = #tpu.dot_dimension_numbers<[1], [0], [0], [1], [0, 0, 1, 1], [], []>} : vector<8x1024xbf16>, vector<1024x256xbf16>, vector<8x256xf32> -> vector<8x256xf32>
    %31 = vector.broadcast %29 : vector<1x256xf32> to vector<8x256xf32>
    %32 = arith.addf %30, %31 : vector<8x256xf32>
    %33 = math.tanh %32 : vector<8x256xf32>
    %c0_23 = arith.constant 0 : index
    %c0_24 = arith.constant 0 : index
    %34 = vector.load %arg10[%c0_23, %c0_24] : memref<8x256xf32, #tpu.memory_space<vmem>>, vector<8x256xf32>
    tpu.vector_store %arg10[%c0_23, %c0_24], %33 {strides = array<i32>} : memref<8x256xf32, #tpu.memory_space<vmem>>, vector<8x256xf32>,
    return
  }
  func.func @transform_0(%arg0: i32) -> (i32, i32) {
    %c0_i32 = arith.constant 0 : i32
    %c0_i32_0 = arith.constant 0 : i32
    return %arg0, %c0_i32 : i32, i32
  }
  func.func @transform_1(%arg0: i32) -> (i32, i32) {
    %c0_i32 = arith.constant 0 : i32
    %c0_i32_0 = arith.constant 0 : i32
    %c0_i32_1 = arith.constant 0 : i32
    return %c0_i32, %c0_i32_0 : i32, i32
  }
  func.func @transform_2(%arg0: i32) -> (i32, i32) {
    %c0_i32 = arith.constant 0 : i32
    %c0_i32_0 = arith.constant 0 : i32
    %c0_i32_1 = arith.constant 0 : i32
    return %c0_i32, %c0_i32_0 : i32, i32
  }
  func.func @transform_3(%arg0: i32) -> (i32, i32) {
    %c0_i32 = arith.constant 0 : i32
    %c0_i32_0 = arith.constant 0 : i32
    %c0_i32_1 = arith.constant 0 : i32
    return %c0_i32, %c0_i32_0 : i32, i32
  }
  func.func @transform_4(%arg0: i32) -> (i32, i32) {
    %c0_i32 = arith.constant 0 : i32
    %c0_i32_0 = arith.constant 0 : i32
    %c0_i32_1 = arith.constant 0 : i32
    return %c0_i32, %c0_i32_0 : i32, i32
  }
  func.func @transform_5(%arg0: i32) -> (i32, i32) {
    %c0_i32 = arith.constant 0 : i32
    %c0_i32_0 = arith.constant 0 : i32
    %c0_i32_1 = arith.constant 0 : i32
    return %c0_i32, %c0_i32_0 : i32, i32
  }
  func.func @transform_6(%arg0: i32) -> (i32, i32) {
    %c0_i32 = arith.constant 0 : i32
    %c0_i32_0 = arith.constant 0 : i32
    %c0_i32_1 = arith.constant 0 : i32
    return %c0_i32, %c0_i32_0 : i32, i32
  }
  func.func @transform_7(%arg0: i32) -> (i32, i32) {
    %c0_i32 = arith.constant 0 : i32
    %c0_i32_0 = arith.constant 0 : i32
    %c0_i32_1 = arith.constant 0 : i32
    return %c0_i32, %c0_i32_0 : i32, i32
  }
  func.func @transform_8(%arg0: i32) -> (i32, i32) {
    %c0_i32 = arith.constant 0 : i32
    %c0_i32_0 = arith.constant 0 : i32
    %c0_i32_1 = arith.constant 0 : i32
    return %c0_i32, %c0_i32_0 : i32, i32
  }
  func.func @transform_9(%arg0: i32) -> (i32, i32) {
    %c0_i32 = arith.constant 0 : i32
    %c0_i32_0 = arith.constant 0 : i32
    return %arg0, %c0_i32 : i32, i32
  }
}

</mosaic_0001>

<bundles_post_ra>
// kernel: tpu_custom_call.1
= control target key start
LH: loop header
LB: loop body
LE: loop exit
PB: predicated region body
PF: predicated region fallthrough
CT: control target
= control target key end

     0   :  { %14 = vsyncpa [#allocation3], 0  ;;  %s4778_s0 = inlined_call_operand.hbm [shape: bf16[8,128], index: 0, kind: input, shape index: {}]   ;;  %s4779_s1 = inlined_call_operand.hbm [shape: bf16[128,256], index: 1, kind: input, shape index: {}]   ;;  %s4780_s2 = inlined_call_operand.vmem [shape: f32[1,256], index: 2, kind: input, shape index: {}]   ;;  %s4781_s3 = inlined_call_operand.hbm [shape: bf16[256,512], index: 3, kind: input, shape index: {}]   ;;  %s4782_s4 = inlined_call_operand.hbm [shape: f32[1,512], index: 4, kind: input, shape index: {}]   ;;  %s4783_s5 = inlined_call_operand.hbm [shape: bf16[512,1024], index: 5, kind: input, shape index: {}]   ;;  %s4784_s6 = inlined_call_operand.vmem [shape: f32[1,1024], index: 6, kind: input, shape index: {}]   ;;  %s4785_s7 = inlined_call_operand.hbm [shape: bf16[1024,256], index: 7, kind: input, shape index: {}]   ;;  %s4786_s8 = inlined_call_operand.vmem [shape: f32[1,256], index: 8, kind: input, shape index: {}]   ;;  %s4787_s9 = inlined_call_operand.hbm [shape: f32[8,256], index: 9, kind: output, shape index: {}]  }
   0x1   :  { %15 = vsyncpa [#allocation6], 0 }
   0x2   :  { %16 = vsyncpa [#allocation9], 0 }
   0x3   :  { %17 = vsyncpa [#allocation12], 0 }
   0x4   :  { %18 = vsyncpa [#allocation4], 0  ;;  %s4608_s30 = smov [#allocation5]  }
   0x5   :  { %s34_s10 = sshll.u32 %s4608_s30, 4  ;;  %s35_s10 = int_to_ptr.vmem [resolvable:$true] %s34_s10 }
   0x6   :  { %s4466_s11 = scalar_lea.vmem %s35_s10, 2048  ;;  %p4471_p1 = scmp.lt.s32.totalorder %s35_s10, %s35_s10 }
   0x7   :  { %p4467_p0 = scmp.ne.s32.totalorder %s35_s10, %s4466_s11  ;;  %p4472_p2 = scmp.lt.s32.totalorder %s4466_s11, %s4466_s11 }
   0x9   :  { %p4473_p3 = por %p4472_p2, %p4471_p1 }
   0xb   :  { %p4474_p4 = pnand %p4473_p3, %p4467_p0 }
   0xd   :  { %4477 = shalt.err (!%p4474_p4)
}
   0xe   :  { %s4609_s12 = smov 128   ;;  %s4610_s13 = smov 8  }
   0xf   :  { %40 = dma.hbm_to_vmem [thread:$0]  %s4779_s1, 2048, %s35_s10, [#allocation6], %s4609_s12, %s4609_s12, %s4610_s13  }
  0x10   :  { %s4611_s16 = smov [#allocation8]   ;;  %s4612_s18 = smov [#allocation2]  }
  0x11   :  { %s61_s17 = sshll.u32 %s4611_s16, 4  ;;  %s25_s19 = sshll.u32 %s4612_s18, 4  ;;  %s62_s17 = int_to_ptr.vmem [resolvable:$true] %s61_s17  ;;  %s26_s19 = int_to_ptr.vmem [resolvable:$true] %s25_s19 }
  0x12   :  { %s4486_s20 = scalar_lea.vmem %s62_s17, 64  ;;  %p4491_p6 = scmp.lt.s32.totalorder %s62_s17, %s62_s17 }
  0x13   :  { %p4487_p5 = scmp.ne.s32.totalorder %s62_s17, %s4486_s20  ;;  %p4492_p7 = scmp.lt.s32.totalorder %s4486_s20, %s4486_s20 }
  0x15   :  { %p4493_p8 = por %p4492_p7, %p4491_p6 }
  0x17   :  { %p4494_p9 = pnand %p4493_p8, %p4487_p5 }
  0x19   :  { %4497 = shalt.err (!%p4494_p9)
}
  0x1a   :  { %64 = dma.hbm_to_vmem [thread:$0]  %s4782_s4, 64, %s62_s17, [#allocation9]  }
  0x1b   :  { %s4506_s23 = scalar_lea.vmem %s26_s19, 64  ;;  %p4511_p11 = scmp.lt.s32.totalorder %s26_s19, %s26_s19 }
  0x1c   :  { %p4507_p10 = scmp.ne.s32.totalorder %s26_s19, %s4506_s23  ;;  %p4512_p12 = scmp.lt.s32.totalorder %s4506_s23, %s4506_s23 }
  0x1e   :  { %p4513_p13 = por %p4512_p12, %p4511_p11 }
  0x20   :  { %p4514_p0 = pnand %p4513_p13, %p4507_p10 }
  0x22   :  { %4517 = shalt.err (!%p4514_p0)
}
  0x23   :  { %28 = dma.hbm_to_vmem [thread:$0]  %s4778_s0, 64, %s26_s19, [#allocation3]  }
  0x24   :  { %s4613_s25 = smov [#allocation7]  }
  0x25   :  { %s48_s26 = sshll.u32 %s4613_s25, 4  ;;  %s49_s26 = int_to_ptr.vmem [resolvable:$true] %s48_s26 }
  0x26   :  { %s4526_s27 = scalar_lea.vmem %s49_s26, 8192  ;;  %p4531_p2 = scmp.lt.s32.totalorder %s49_s26, %s49_s26 }
  0x27   :  { %p4527_p1 = scmp.ne.s32.totalorder %s49_s26, %s4526_s27  ;;  %p4532_p3 = scmp.lt.s32.totalorder %s4526_s27, %s4526_s27 }
  0x29   :  { %p4533_p4 = por %p4532_p3, %p4531_p2 }
  0x2b   :  { %p4534_p5 = pnand %p4533_p4, %p4527_p1 }
  0x2d   :  { %4537 = shalt.err (!%p4534_p5)
}
  0x2e   :  { %s4614_s4 = smov 256   ;;  %s4615_s28 = smov 16  }
  0x2f   :  { %54 = dma.hbm_to_vmem [thread:$0]  %s4781_s3, 8192, %s49_s26, [#allocation6], %s4614_s4, %s4614_s4, %s4615_s28  }
  0x30   :  { %s4616_s10 = smov [#allocation10]  }
  0x31   :  { %s70_s11 = sshll.u32 %s4616_s10, 4  ;;  %s71_s11 = int_to_ptr.vmem [resolvable:$true] %s70_s11 }
  0x32   :  { %s4546_s0 = scalar_lea.vmem %s71_s11, 32768  ;;  %p4551_p7 = scmp.lt.s32.totalorder %s71_s11, %s71_s11 }
  0x33   :  { %p4547_p6 = scmp.ne.s32.totalorder %s71_s11, %s4546_s0  ;;  %p4552_p8 = scmp.lt.s32.totalorder %s4546_s0, %s4546_s0 }
  0x35   :  { %p4553_p9 = por %p4552_p8, %p4551_p7 }
  0x37   :  { %p4554_p10 = pnand %p4553_p9, %p4547_p6 }
  0x39   :  { %4557 = shalt.err (!%p4554_p10)
}
  0x3a   :  { %s4617_s14 = smov 512   ;;  %s4618_s15 = smov 32  }
  0x3b   :  { %76 = dma.hbm_to_vmem [thread:$0]  %s4783_s5, 32768, %s71_s11, [#allocation9], %s4617_s14, %s4617_s14, %s4618_s15  }
  0x3c   :  { %s4619_s18 = smov [#allocation11]  }
  0x3d   :  { %s84_s19 = sshll.u32 %s4619_s18, 4  ;;  %s85_s19 = int_to_ptr.vmem [resolvable:$true] %s84_s19 }
  0x3e   :  { %s4566_s3 = scalar_lea.vmem %s85_s19, 16384  ;;  %p4571_p12 = scmp.lt.s32.totalorder %s85_s19, %s85_s19 }
  0x3f   :  { %p4567_p11 = scmp.ne.s32.totalorder %s85_s19, %s4566_s3  ;;  %p4572_p13 = scmp.lt.s32.totalorder %s4566_s3, %s4566_s3 }
  0x41   :  { %p4573_p0 = por %p4572_p13, %p4571_p12 }
  0x43   :  { %p4574_p1 = pnand %p4573_p0, %p4567_p11 }
  0x45   :  { %4577 = shalt.err (!%p4574_p1)
}
  0x46   :  { %90 = dma.hbm_to_vmem [thread:$0]  %s4785_s7, 16384, %s85_s19, [#allocation12], %s4609_s12, %s4609_s12, %s4610_s13  }
  0x47   :  { %4598 = dma.done.wait [#allocation3], 64  }
  0x48   :  { %4599 = vsyncadd [#allocation3], 4294967232 }
  0x49   :  { %4600 = dma.done.wait [#allocation6], 10240  }
  0x4a   :  { %4601 = vsyncadd [#allocation6], 4294957056 }
  0x4b   :  { %4602 = dma.done.wait [#allocation9], 32832  }
  0x4c   :  { %4603 = vsyncadd [#allocation9], 4294934464 }
  0x4d   :  { %4604 = dma.done.wait [#allocation12], 16384  }
  0x4e   :  { %4605 = vsyncadd [#allocation12], 4294950912  ;;  %v4620_v0 = vmov 0   ;;  %v4142_v1 = vld [vmem:[#allocation5 + $0x74] ss:$8 sps:$4 sm:$0xff]  }
  0x4f   :  { %253 = vmatprep.mubr.bf16.mxu0 %v4620_v0  ;;  %v4144_v2 = vld [vmem:[#allocation5 + $0x70] ss:$8 sps:$4 sm:$0xff]   ;;  %221 = vmatprep.subr.bf16.mxu0 %v4142_v1  ;;  %v4145_v3 = vld [vmem:[#allocation5 + $0x64] ss:$8 sps:$4 sm:$0xff]   ;;  %v4147_v4 = vld [vmem:[#allocation5 + $0x60] ss:$8 sps:$4 sm:$0xff]  }
  0x50   :  { %222 = vmatpush1.bf16.msra.mxu0 %v4144_v2  ;;  %v4148_v5 = vld [vmem:[#allocation5 + $0x54] ss:$8 sps:$4 sm:$0xff]   ;;  %v4150_v6 = vld [vmem:[#allocation5 + $0x50] ss:$8 sps:$4 sm:$0xff]   ;;  %v4151_v7 = vld [vmem:[#allocation5 + $0x44] ss:$8 sps:$4 sm:$0xff]  }
  0x51   :  { %223 = vmatprep.subr.bf16.mxu0 %v4145_v3  ;;  %v4153_v8 = vld [vmem:[#allocation5 + $0x40] ss:$8 sps:$4 sm:$0xff]   ;;  %v4166_v9 = vld [vmem:[#allocation7 + $0xe4] ss:$16 sps:$4 sm:$0xff]   ;;  %v4156_v13 = vld [vmem:[#allocation5 + $0x30] ss:$8 sps:$4 sm:$0xff]  }
  0x52   :  { %v4154_v10 = vld [vmem:[#allocation5 + $0x34] ss:$8 sps:$4 sm:$0xff]   ;;  %674 = vmatprep.subr.bf16.mxu1 %v4166_v9  ;;  %v4171_v11 = vld [vmem:[#allocation7 + $0xe0] ss:$16 sps:$4 sm:$0xff]   ;;  %v4157_v14 = vld [vmem:[#allocation5 + $0x24] ss:$8 sps:$4 sm:$0xff]  }
  0x53   :  { %v4172_v12 = vld [vmem:[#allocation7 + $0xc4] ss:$16 sps:$4 sm:$0xff]   ;;  %675 = vmatpush1.bf16.msra.mxu1 %v4171_v11  ;;  %v4177_v15 = vld [vmem:[#allocation7 + $0xc0] ss:$16 sps:$4 sm:$0xff]   ;;  %v4170_v26 = vld [vmem:[#allocation7 + $0xec] ss:$16 sps:$4 sm:$0xff]  }
  0x54   :  { %224 = vmatpush1.bf16.msra.mxu0 %v4147_v4  ;;  %676 = vmatprep.subr.bf16.mxu1 %v4172_v12  ;;  %v4178_v16 = vld [vmem:[#allocation7 + $0xa4] ss:$16 sps:$4 sm:$0xff]   ;;  %v4159_v17 = vld [vmem:[#allocation5 + $0x20] ss:$8 sps:$4 sm:$0xff]   ;;  %v4162_v21 = vld [vmem:[#allocation5 + $0x10] ss:$8 sps:$4 sm:$0xff]  }
  0x55   :  { %225 = vmatprep.subr.bf16.mxu0 %v4148_v5  ;;  %v4160_v18 = vld [vmem:[#allocation5 + $0x14] ss:$8 sps:$4 sm:$0xff]   ;;  %v4183_v19 = vld [vmem:[#allocation7 + $0xa0] ss:$16 sps:$4 sm:$0xff]   ;;  %v4163_v22 = vld [vmem:[#allocation5 + $0x4] ss:$8 sps:$4 sm:$0xff]  }
  0x56   :  { %v4184_v20 = vld [vmem:[#allocation7 + $0x84] ss:$16 sps:$4 sm:$0xff]   ;;  %v4189_v23 = vld [vmem:[#allocation7 + $0x80] ss:$16 sps:$4 sm:$0xff]   ;;  %v112_v29 = vld [vmem:[#allocation2] sm:$0xf] }
  0x57   :  { %677 = vmatpush1.bf16.msra.mxu1 %v4177_v15  ;;  %v4190_v24 = vld [vmem:[#allocation7 + $0x64] ss:$16 sps:$4 sm:$0xff]   ;;  %v4165_v25 = vld [vmem:[#allocation5] ss:$8 sps:$4 sm:$0xff]   ;;  %v4176_v31 = vld [vmem:[#allocation7 + $0xcc] ss:$16 sps:$4 sm:$0xff]  }
  0x58   :  { %226 = vmatpush1.bf16.msra.mxu0 %v4150_v6  ;;  %678 = vmatprep.subr.bf16.mxu1 %v4178_v16  ;;  %v4195_v27 = vld [vmem:[#allocation7 + $0x60] ss:$16 sps:$4 sm:$0xff]   ;;  %v4196_v28 = vld [vmem:[#allocation7 + $0x44] ss:$16 sps:$4 sm:$0xff]   ;;  %v4168_v30 = vld [vmem:[#allocation7 + $0xe8] ss:$16 sps:$4 sm:$0xff]  }
  0x59   :  { %227 = vmatprep.subr.bf16.mxu0 %v4151_v7  ;;  %v4201_v32 = vld [vmem:[#allocation7 + $0x40] ss:$16 sps:$4 sm:$0xff]   ;;  %v4202_v33 = vld [vmem:[#allocation7 + $0x24] ss:$16 sps:$4 sm:$0xff]   ;;  %v4174_v34 = vld [vmem:[#allocation7 + $0xc8] ss:$16 sps:$4 sm:$0xff]  }
  0x5a   :  { %v4182_v35 = vld [vmem:[#allocation7 + $0xac] ss:$16 sps:$4 sm:$0xff]   ;;  %v4207_v36 = vld [vmem:[#allocation7 + $0x20] ss:$16 sps:$4 sm:$0xff]   ;;  %v4208_v37 = vld [vmem:[#allocation7 + $0x4] ss:$16 sps:$4 sm:$0xff]  }
  0x5b   :  { %679 = vmatpush1.bf16.msra.mxu1 %v4183_v19  ;;  %v4180_v38 = vld [vmem:[#allocation7 + $0xa8] ss:$16 sps:$4 sm:$0xff]   ;;  %v4188_v39 = vld [vmem:[#allocation7 + $0x8c] ss:$16 sps:$4 sm:$0xff]   ;;  %v4213_v40 = vld [vmem:[#allocation7] ss:$16 sps:$4 sm:$0xff]  }
  0x5c   :  { %228 = vmatpush1.bf16.msra.mxu0 %v4153_v8  ;;  %680 = vmatprep.subr.bf16.mxu1 %v4184_v20  ;;  %v4214_v41 = vld [vmem:[#allocation7 + $0x1e4] ss:$16 sps:$4 sm:$0xff]   ;;  %v4186_v42 = vld [vmem:[#allocation7 + $0x88] ss:$16 sps:$4 sm:$0xff]   ;;  %v4194_v43 = vld [vmem:[#allocation7 + $0x6c] ss:$16 sps:$4 sm:$0xff]  }
  0x5d   :  { %229 = vmatprep.subr.bf16.mxu0 %v4154_v10  ;;  %v4219_v44 = vld [vmem:[#allocation7 + $0x1e0] ss:$16 sps:$4 sm:$0xff]   ;;  %v4220_v45 = vld [vmem:[#allocation7 + $0x1c4] ss:$16 sps:$4 sm:$0xff]   ;;  %v4192_v46 = vld [vmem:[#allocation7 + $0x68] ss:$16 sps:$4 sm:$0xff]  }
  0x5e   :  { %v4225_v47 = vld [vmem:[#allocation7 + $0x1c0] ss:$16 sps:$4 sm:$0xff]   ;;  %v4200_v48 = vld [vmem:[#allocation7 + $0x4c] ss:$16 sps:$4 sm:$0xff]   ;;  %v4226_v49 = vld [vmem:[#allocation7 + $0x1a4] ss:$16 sps:$4 sm:$0xff]  }
  0x5f   :  { %681 = vmatpush1.bf16.msra.mxu1 %v4189_v23  ;;  %v4198_v50 = vld [vmem:[#allocation7 + $0x48] ss:$16 sps:$4 sm:$0xff]   ;;  %v4231_v51 = vld [vmem:[#allocation7 + $0x1a0] ss:$16 sps:$4 sm:$0xff]   ;;  %v4206_v52 = vld [vmem:[#allocation7 + $0x2c] ss:$16 sps:$4 sm:$0xff]  }
  0x60   :  { %230 = vmatpush1.bf16.msra.mxu0 %v4156_v13  ;;  %682 = vmatprep.subr.bf16.mxu1 %v4190_v24  ;;  %v4232_v53 = vld [vmem:[#allocation7 + $0x184] ss:$16 sps:$4 sm:$0xff]   ;;  %v4204_v54 = vld [vmem:[#allocation7 + $0x28] ss:$16 sps:$4 sm:$0xff]   ;;  %v4237_v55 = vld [vmem:[#allocation7 + $0x180] ss:$16 sps:$4 sm:$0xff]  }
  0x61   :  { %231 = vmatprep.subr.bf16.mxu0 %v4157_v14  ;;  %v4212_v56 = vld [vmem:[#allocation7 + $0xc] ss:$16 sps:$4 sm:$0xff]   ;;  %v4238_v57 = vld [vmem:[#allocation7 + $0x164] ss:$16 sps:$4 sm:$0xff]   ;;  %v4210_v58 = vld [vmem:[#allocation7 + $0x8] ss:$16 sps:$4 sm:$0xff]  }
  0x62   :  { %v4243_v59 = vld [vmem:[#allocation7 + $0x160] ss:$16 sps:$4 sm:$0xff]   ;;  %v4218_v60 = vld [vmem:[#allocation7 + $0x1ec] ss:$16 sps:$4 sm:$0xff]   ;;  %v4216_v61 = vld [vmem:[#allocation7 + $0x1e8] ss:$16 sps:$4 sm:$0xff]  }
  0x63   :  { %683 = vmatpush1.bf16.msra.mxu1 %v4195_v27  ;;  %v4224_v62 = vld [vmem:[#allocation7 + $0x1cc] ss:$16 sps:$4 sm:$0xff]   ;;  %v4222_v63 = vld [vmem:[#allocation7 + $0x1c8] ss:$16 sps:$4 sm:$0xff]   ;;  %v4244_v6 = vld [vmem:[#allocation7 + $0x144] ss:$16 sps:$4 sm:$0xff]  }
  0x64   :  { %232 = vmatpush1.bf16.msra.mxu0 %v4159_v17  ;;  %684 = vmatprep.subr.bf16.mxu1 %v4196_v28  ;;  %v4230_v0 = vld [vmem:[#allocation7 + $0x1ac] ss:$16 sps:$4 sm:$0xff]   ;;  %v4228_v1 = vld [vmem:[#allocation7 + $0x1a8] ss:$16 sps:$4 sm:$0xff]   ;;  %v4249_v9 = vld [vmem:[#allocation7 + $0x140] ss:$16 sps:$4 sm:$0xff]  }
  0x65   :  { %233 = vmatprep.subr.bf16.mxu0 %v4160_v18  ;;  %v4236_v2 = vld [vmem:[#allocation7 + $0x18c] ss:$16 sps:$4 sm:$0xff]   ;;  %v4234_v3 = vld [vmem:[#allocation7 + $0x188] ss:$16 sps:$4 sm:$0xff]   ;;  %v4250_v10 = vld [vmem:[#allocation7 + $0x124] ss:$16 sps:$4 sm:$0xff]  }
  0x66   :  { %v4242_v4 = vld [vmem:[#allocation7 + $0x16c] ss:$16 sps:$4 sm:$0xff]   ;;  %v4240_v5 = vld [vmem:[#allocation7 + $0x168] ss:$16 sps:$4 sm:$0xff]   ;;  %v4255_v13 = vld [vmem:[#allocation7 + $0x120] ss:$16 sps:$4 sm:$0xff]  }
  0x67   :  { %685 = vmatpush1.bf16.msra.mxu1 %v4201_v32  ;;  %v4248_v7 = vld [vmem:[#allocation7 + $0x14c] ss:$16 sps:$4 sm:$0xff]   ;;  %v4246_v8 = vld [vmem:[#allocation7 + $0x148] ss:$16 sps:$4 sm:$0xff]   ;;  %v4256_v14 = vld [vmem:[#allocation7 + $0x104] ss:$16 sps:$4 sm:$0xff]  }
  0x68   :  { %234 = vmatpush1.bf16.msra.mxu0 %v4162_v21  ;;  %686 = vmatprep.subr.bf16.mxu1 %v4202_v33  ;;  %v4254_v11 = vld [vmem:[#allocation7 + $0x12c] ss:$16 sps:$4 sm:$0xff]   ;;  %v4252_v12 = vld [vmem:[#allocation7 + $0x128] ss:$16 sps:$4 sm:$0xff]   ;;  %v4261_v17 = vld [vmem:[#allocation7 + $0x100] ss:$16 sps:$4 sm:$0xff]  }
  0x69   :  { %235 = vmatprep.subr.bf16.mxu0 %v4163_v22  ;;  %v4260_v15 = vld [vmem:[#allocation7 + $0x10c] ss:$16 sps:$4 sm:$0xff]   ;;  %v4258_v16 = vld [vmem:[#allocation7 + $0x108] ss:$16 sps:$4 sm:$0xff]  }
  0x6a   :  { %v824_v18 = vld [vmem:[#allocation10 + $0x1c0] sm:$0xff] }
  0x6b   :  { %687 = vmatpush1.bf16.msra.mxu1 %v4207_v36  ;;  %v828_v19 = vld [vmem:[#allocation10 + $0x1e0] sm:$0xff] }
  0x6c   :  { %236 = vmatpush1.bf16.msra.mxu0 %v4165_v25  ;;  %688 = vmatprep.subr.bf16.mxu1 %v4208_v37  ;;  %v952_v20 = vld [vmem:[#allocation10 + $0x5c0] sm:$0xff]  ;;  %v3800_v21 = vcombine.low %v824_v18, %v828_v19  ;;  %v3801_v22 = vcombine.high %v824_v18, %v828_v19 }
  0x6d   :  { %715 = vmatprep.subr.bf16.mxu0 %v4170_v26  ;;  %v956_v23 = vld [vmem:[#allocation10 + $0x5e0] sm:$0xff]  ;;  %v131_v26 = vlaneseq }
  0x6e   :  { %v3928_v24 = vcombine.low %v952_v20, %v956_v23  ;;  %v3929_v25 = vcombine.high %v952_v20, %v956_v23  ;;  %v776_v19 = vld [vmem:[#allocation10 + $0x40] sm:$0xff] }
  0x6f   :  { %254 = vmatmul.mubr.bf16.vlgmr.msra.gmra.mxu0 %v112_v29  ;;  %689 = vmatpush1.bf16.msra.mxu1 %v4213_v40  ;;  %v4696_v27 = vshrl.u32 %v131_v26, 7  ;;  %v129_v29 = vld [vmem:[%s4780_s2] sm:$0x3]  ;;  %v780_v20 = vld [vmem:[#allocation10 + $0x60] sm:$0xff] }
  0x70   :  { %716 = vmatpush1.bf16.msra.mxu0 %v4168_v30  ;;  %690 = vmatprep.subr.bf16.mxu1 %v4214_v41 }
  0x71   :  { %717 = vmatprep.subr.bf16.mxu0 %v4176_v31  ;;  %v4699_v28 = vsub.s32 0, %v4696_v27  ;;  %v4705_v30 = vsub.s32 1, %v4696_v27 }
  0x73   :  { %691 = vmatpush2.bf16.msra.mxu1 %v4219_v44  ;;  %v134_v31 = vrot.slane %v129_v29, %v4699_v28  ;;  %v138_v32 = vrot.slane %v129_v29, %v4705_v30  ;;  %v820_v44 = vld [vmem:[#allocation10 + $0x1a0] sm:$0xff] }
  0x74   :  { %718 = vmatpush1.bf16.msra.mxu0 %v4174_v34  ;;  %692 = vmatprep.subr.bf16.mxu1 %v4220_v45  ;;  %v944_v45 = vld [vmem:[#allocation10 + $0x580] sm:$0xff] }
  0x75   :  { %719 = vmatprep.subr.bf16.mxu0 %v4182_v35  ;;  %v768_v29 = vld [vmem:[#allocation10] sm:$0xff] }
  0x77   :  { %693 = vmatpush2.bf16.msra.mxu1 %v4225_v47 }
  0x78   :  { %720 = vmatpush1.bf16.msra.mxu0 %v4180_v38  ;;  %694 = vmatprep.subr.bf16.mxu1 %v4226_v49 }
  0x79   :  { %721 = vmatprep.subr.bf16.mxu0 %v4188_v39 }
  0x7b   :  { %695 = vmatpush2.bf16.msra.mxu1 %v4231_v51  ;;  %v808_v51 = vld [vmem:[#allocation10 + $0x140] sm:$0xff] }
  0x7c   :  { %722 = vmatpush1.bf16.msra.mxu0 %v4186_v42  ;;  %696 = vmatprep.subr.bf16.mxu1 %v4232_v53  ;;  %v816_v42 = vld [vmem:[#allocation10 + $0x180] sm:$0xff] }
  0x7d   :  { %723 = vmatprep.subr.bf16.mxu0 %v4194_v43  ;;  %v3793_v49 = vcombine.high %v816_v42, %v820_v44  ;;  %v936_v53 = vld [vmem:[#allocation10 + $0x540] sm:$0xff] }
  0x7f   :  { %697 = vmatpush2.bf16.msra.mxu1 %v4237_v55  ;;  %v3792_v55 = vcombine.low %v816_v42, %v820_v44 }
  0x80   :  { %724 = vmatpush1.bf16.msra.mxu0 %v4192_v46  ;;  %698 = vmatprep.subr.bf16.mxu1 %v4238_v57  ;;  %v948_v46 = vld [vmem:[#allocation10 + $0x5a0] sm:$0xff] }
  0x81   :  { %725 = vmatprep.subr.bf16.mxu0 %v4200_v48 }
  0x83   :  { %699 = vmatpush2.bf16.msra.mxu1 %v4243_v59  ;;  %v800_v59 = vld [vmem:[#allocation10 + $0x100] sm:$0xff] }
  0x84   :  { %726 = vmatpush1.bf16.msra.mxu0 %v4198_v50  ;;  %700 = vmatprep.subr.bf16.mxu1 %v4244_v6  ;;  %v3921_v50 = vcombine.high %v944_v45, %v948_v46  ;;  %v924_v6 = vld [vmem:[#allocation10 + $0x4e0] sm:$0xff] }
  0x85   :  { %727 = vmatprep.subr.bf16.mxu0 %v4206_v52  ;;  %v812_v52 = vld [vmem:[#allocation10 + $0x160] sm:$0xff] }
  0x86   :  { %v3785_v57 = vcombine.high %v808_v51, %v812_v52 }
  0x87   :  { %701 = vmatpush2.bf16.msra.mxu1 %v4249_v9 }
  0x88   :  { %728 = vmatpush1.bf16.msra.mxu0 %v4204_v54  ;;  %702 = vmatprep.subr.bf16.mxu1 %v4250_v10  ;;  %v940_v54 = vld [vmem:[#allocation10 + $0x560] sm:$0xff] }
  0x89   :  { %729 = vmatprep.subr.bf16.mxu0 %v4212_v56  ;;  %v3920_v56 = vcombine.low %v944_v45, %v948_v46  ;;  %v880_v46 = vld [vmem:[#allocation10 + $0x380] sm:$0xff] }
  0x8b   :  { %703 = vmatpush2.bf16.msra.mxu1 %v4255_v13  ;;  %v912_v13 = vld [vmem:[#allocation10 + $0x480] sm:$0xff] }
  0x8c   :  { %730 = vmatpush1.bf16.msra.mxu0 %v4210_v58  ;;  %704 = vmatprep.subr.bf16.mxu1 %v4256_v14  ;;  %v3913_v58 = vcombine.high %v936_v53, %v940_v54  ;;  %v916_v14 = vld [vmem:[#allocation10 + $0x4a0] sm:$0xff] }
  0x8d   :  { %731 = vmatprep.subr.bf16.mxu0 %v4218_v60  ;;  %v804_v60 = vld [vmem:[#allocation10 + $0x120] sm:$0xff]  ;;  %v3889_v18 = vcombine.high %v912_v13, %v916_v14 }
  0x8f   :  { %705 = vmatpush2.bf16.msra.mxu1 %v4261_v17 }
  0x90   :  { %732 = vmatpush2.bf16.msra.mxu0 %v4216_v61  ;;  %2346 = vmatprep.subr.bf16.mxu1 %v3801_v22  ;;  %v928_v61 = vld [vmem:[#allocation10 + $0x500] sm:$0xff] }
  0x91   :  { %733 = vmatprep.subr.bf16.mxu0 %v4224_v62  ;;  %v932_v62 = vld [vmem:[#allocation10 + $0x520] sm:$0xff] }
  0x92   :  { %v908_v22 = vld [vmem:[#allocation10 + $0x460] sm:$0xff] }
  0x94   :  { %734 = vmatpush2.bf16.msra.mxu0 %v4222_v63  ;;  %v3784_v63 = vcombine.low %v808_v51, %v812_v52 }
  0x95   :  { %735 = vmatprep.subr.bf16.mxu0 %v4230_v0  ;;  %v3912_v0 = vcombine.low %v936_v53, %v940_v54  ;;  %v872_v54 = vld [vmem:[#allocation10 + $0x340] sm:$0xff] }
  0x98   :  { %736 = vmatpush2.bf16.msra.mxu0 %v4228_v1  ;;  %v3777_v1 = vcombine.high %v800_v59, %v804_v60 }
  0x99   :  { %737 = vmatprep.subr.bf16.mxu0 %v4236_v2  ;;  %v3905_v2 = vcombine.high %v928_v61, %v932_v62 }
  0x9c   :  { %738 = vmatpush2.bf16.msra.mxu0 %v4234_v3  ;;  %v792_v3 = vld [vmem:[#allocation10 + $0xc0] sm:$0xff] }
  0x9d   :  { %739 = vmatprep.subr.bf16.mxu0 %v4242_v4  ;;  %v796_v4 = vld [vmem:[#allocation10 + $0xe0] sm:$0xff] }
  0x9e   :  { %v3769_v9 = vcombine.high %v792_v3, %v796_v4 }
  0xa0   :  { %740 = vmatpush2.bf16.msra.mxu0 %v4240_v5  ;;  %v920_v5 = vld [vmem:[#allocation10 + $0x4c0] sm:$0xff] }
  0xa1   :  { %741 = vmatprep.subr.bf16.mxu0 %v4248_v7  ;;  %v3776_v7 = vcombine.low %v800_v59, %v804_v60  ;;  %v3897_v10 = vcombine.high %v920_v5, %v924_v6 }
  0xa4   :  { %742 = vmatpush2.bf16.msra.mxu0 %v4246_v8  ;;  %v3904_v8 = vcombine.low %v928_v61, %v932_v62  ;;  %v864_v62 = vld [vmem:[#allocation10 + $0x300] sm:$0xff] }
  0xa5   :  { %743 = vmatprep.subr.bf16.mxu0 %v4254_v11  ;;  %v784_v11 = vld [vmem:[#allocation10 + $0x80] sm:$0xff] }
  0xa8   :  { %744 = vmatpush2.bf16.msra.mxu0 %v4252_v12  ;;  %v788_v12 = vld [vmem:[#allocation10 + $0xa0] sm:$0xff] }
  0xa9   :  { %745 = vmatprep.subr.bf16.mxu0 %v4260_v15  ;;  %v3768_v15 = vcombine.low %v792_v3, %v796_v4  ;;  %v3761_v17 = vcombine.high %v784_v11, %v788_v12  ;;  %v3760_v23 = vcombine.low %v784_v11, %v788_v12 }
  0xac   :  { %746 = vmatpush2.bf16.msra.mxu0 %v4258_v16  ;;  %v3896_v16 = vcombine.low %v920_v5, %v924_v6  ;;  %v856_v6 = vld [vmem:[#allocation10 + $0x2c0] sm:$0xff] }
  0xad   :  { %2387 = vmatprep.subr.bf16.mxu0 %v3929_v25  ;;  %v3753_v25 = vcombine.high %v776_v19, %v780_v20 }
 0x12f   :  { %v255_v33 = vpop.f32.mrf.mxu0 }
 0x130   :  { %v256_v34 = vadd.f32 %v255_v33, %v134_v31  ;;  %v772_v31 = vld [vmem:[#allocation10 + $0x20] sm:$0xff] }
 0x131   :  { %v257_v35 = vpop.f32.mrf.mxu0  ;;  %v900_v33 = vld [vmem:[#allocation10 + $0x420] sm:$0xff]  ;;  %v3744_v42 = vcombine.low %v768_v29, %v772_v31 }
 0x132   :  { %v262_v36 = vmul.f32 0.2, %v256_v34  ;;  %v258_v37 = vadd.f32 %v257_v35, %v138_v32  ;;  %v896_v32 = vld [vmem:[#allocation10 + $0x400] sm:$0xff] }
 0x133   :  { %v259_v38 = vpop.f32.mrf.mxu0 }
 0x134   :  { %v263_v39 = vmul.f32 0.2, %v258_v37  ;;  %v264_v40 = vmax.f32 %v256_v34, %v262_v36  ;;  %v3752_v34 = vcombine.low %v776_v19, %v780_v20  ;;  %v3745_v36 = vcombine.high %v768_v29, %v772_v31  ;;  %v888_v38 = vld [vmem:[#allocation10 + $0x3c0] sm:$0xff] }
 0x135   :  { %v260_v41 = vpop.f32.mrf.mxu0  ;;  %v972_v31 = vld [vmem:[#allocation10 + $0x660] sm:$0xff] }
 0x136   :  { %v265_v43 = vmax.f32 %v258_v37, %v263_v39  ;;  %v266_v48 = vpack.c.bf16 %v264_v40, %v264_v40  ;;  %v3873_v37 = vcombine.high %v896_v32, %v900_v33  ;;  %v892_v39 = vld [vmem:[#allocation10 + $0x3e0] sm:$0xff] }
 0x137   :  { %v1016_v40 = vld [vmem:[#allocation10 + $0x7c0] sm:$0xff]  ;;  %v3865_v44 = vcombine.high %v888_v38, %v892_v39 }
 0x138   :  { %v267_v47 = vpack.c.bf16 %v265_v43, %v265_v43  ;;  %v1020_v41 = vld [vmem:[#allocation10 + $0x7e0] sm:$0xff]  ;;  %v3872_v43 = vcombine.low %v896_v32, %v900_v33 }
 0x139   :  { %v3993_v45 = vcombine.high %v1016_v40, %v1020_v41  ;;  %v3992_v51 = vcombine.low %v1016_v40, %v1020_v41 }
 0x13a   :  { %706 = vmatprep.mubr.bf16.mxu1 %v267_v47  ;;  %747 = vmatprep.mubr.bf16.mxu0 %v267_v47  ;;  %v884_v47 = vld [vmem:[#allocation10 + $0x3a0] sm:$0xff] }
 0x13b   :  { %707 = vmatmul.mubr.bf16.vlgmr.msra.gmra.mxu1 %v266_v48  ;;  %748 = vmatmul.mubr.bf16.vlgmr.msra.gmra.mxu0 %v266_v48  ;;  %v1008_v48 = vld [vmem:[#allocation10 + $0x780] sm:$0xff]  ;;  %v3857_v52 = vcombine.high %v880_v46, %v884_v47 }
 0x13c   :  { %2347 = vmatpush1.bf16.msra.mxu1 %v3800_v21  ;;  %2388 = vmatpush1.bf16.msra.mxu0 %v3928_v24  ;;  %v904_v21 = vld [vmem:[#allocation10 + $0x440] sm:$0xff]  ;;  %v3888_v24 = vcombine.low %v912_v13, %v916_v14 }
 0x13d   :  { %2348 = vmatprep.subr.bf16.mxu1 %v3793_v49  ;;  %2389 = vmatprep.subr.bf16.mxu0 %v3921_v50  ;;  %v3881_v26 = vcombine.high %v904_v21, %v908_v22  ;;  %v3880_v35 = vcombine.low %v904_v21, %v908_v22  ;;  %v1012_v49 = vld [vmem:[#allocation10 + $0x7a0] sm:$0xff]  ;;  %v3864_v50 = vcombine.low %v888_v38, %v892_v39 }
 0x13e   :  { %v3985_v53 = vcombine.high %v1008_v48, %v1012_v49  ;;  %v3984_v59 = vcombine.low %v1008_v48, %v1012_v49  ;;  %v848_v14 = vld [vmem:[#allocation10 + $0x280] sm:$0xff] }
 0x13f   :  { %v964_v39 = vld [vmem:[#allocation10 + $0x620] sm:$0xff] }
 0x140   :  { %2349 = vmatpush1.bf16.msra.mxu1 %v3792_v55  ;;  %2390 = vmatpush1.bf16.msra.mxu0 %v3920_v56  ;;  %v876_v55 = vld [vmem:[#allocation10 + $0x360] sm:$0xff] }
 0x141   :  { %2350 = vmatprep.subr.bf16.mxu1 %v3785_v57  ;;  %2391 = vmatprep.subr.bf16.mxu0 %v3913_v58  ;;  %v1000_v56 = vld [vmem:[#allocation10 + $0x740] sm:$0xff]  ;;  %v3856_v58 = vcombine.low %v880_v46, %v884_v47  ;;  %v3849_v60 = vcombine.high %v872_v54, %v876_v55  ;;  %v957_v47 = vld [vmem:[#allocation10 + $0x5e8] sm:$0xff] }
 0x142   :  { %v1004_v57 = vld [vmem:[#allocation10 + $0x760] sm:$0xff] }
 0x143   :  { %v3977_v61 = vcombine.high %v1000_v56, %v1004_v57  ;;  %v3976_v3 = vcombine.low %v1000_v56, %v1004_v57 }
 0x144   :  { %2351 = vmatpush1.bf16.msra.mxu1 %v3784_v63  ;;  %2392 = vmatpush1.bf16.msra.mxu0 %v3912_v0  ;;  %v868_v63 = vld [vmem:[#allocation10 + $0x320] sm:$0xff] }
 0x145   :  { %2352 = vmatprep.subr.bf16.mxu1 %v3777_v1  ;;  %2393 = vmatprep.subr.bf16.mxu0 %v3905_v2  ;;  %v992_v0 = vld [vmem:[#allocation10 + $0x700] sm:$0xff]  ;;  %v3848_v2 = vcombine.low %v872_v54, %v876_v55  ;;  %v3841_v4 = vcombine.high %v864_v62, %v868_v63 }
 0x146   :  { %v996_v1 = vld [vmem:[#allocation10 + $0x720] sm:$0xff] }
 0x147   :  { %v3969_v5 = vcombine.high %v992_v0, %v996_v1  ;;  %v3968_v11 = vcombine.low %v992_v0, %v996_v1 }
 0x148   :  { %2353 = vmatpush1.bf16.msra.mxu1 %v3776_v7  ;;  %2394 = vmatpush1.bf16.msra.mxu0 %v3904_v8  ;;  %v860_v7 = vld [vmem:[#allocation10 + $0x2e0] sm:$0xff] }
 0x149   :  { %2354 = vmatprep.subr.bf16.mxu1 %v3769_v9  ;;  %2395 = vmatprep.subr.bf16.mxu0 %v3897_v10  ;;  %v984_v8 = vld [vmem:[#allocation10 + $0x6c0] sm:$0xff]  ;;  %v3840_v10 = vcombine.low %v864_v62, %v868_v63  ;;  %v3833_v12 = vcombine.high %v856_v6, %v860_v7 }
 0x14a   :  { %v988_v9 = vld [vmem:[#allocation10 + $0x6e0] sm:$0xff] }
 0x14b   :  { %v3961_v13 = vcombine.high %v984_v8, %v988_v9  ;;  %v3960_v19 = vcombine.low %v984_v8, %v988_v9 }
 0x14c   :  { %2355 = vmatpush1.bf16.msra.mxu1 %v3768_v15  ;;  %2396 = vmatpush1.bf16.msra.mxu0 %v3896_v16  ;;  %v852_v15 = vld [vmem:[#allocation10 + $0x2a0] sm:$0xff] }
 0x14d   :  { %2356 = vmatprep.subr.bf16.mxu1 %v3761_v17  ;;  %2397 = vmatprep.subr.bf16.mxu0 %v3889_v18  ;;  %v976_v16 = vld [vmem:[#allocation10 + $0x680] sm:$0xff]  ;;  %v3832_v18 = vcombine.low %v856_v6, %v860_v7  ;;  %v3825_v20 = vcombine.high %v848_v14, %v852_v15  ;;  %v3824_v22 = vcombine.low %v848_v14, %v852_v15  ;;  %v817_v14 = vld [vmem:[#allocation10 + $0x188] sm:$0xff] }
 0x14e   :  { %v980_v17 = vld [vmem:[#allocation10 + $0x6a0] sm:$0xff]  ;;  %v821_v15 = vld [vmem:[#allocation10 + $0x1a8] sm:$0xff] }
 0x14f   :  { %v3953_v21 = vcombine.high %v976_v16, %v980_v17 }
 0x150   :  { %2357 = vmatpush1.bf16.msra.mxu1 %v3760_v23  ;;  %2398 = vmatpush1.bf16.msra.mxu0 %v3888_v24  ;;  %v3952_v23 = vcombine.low %v976_v16, %v980_v17  ;;  %v840_v24 = vld [vmem:[#allocation10 + $0x240] sm:$0xff]  ;;  %v945_v16 = vld [vmem:[#allocation10 + $0x588] sm:$0xff] }
 0x151   :  { %2358 = vmatprep.subr.bf16.mxu1 %v3753_v25  ;;  %2399 = vmatprep.subr.bf16.mxu0 %v3881_v26  ;;  %v844_v25 = vld [vmem:[#allocation10 + $0x260] sm:$0xff]  ;;  %v949_v17 = vld [vmem:[#allocation10 + $0x5a8] sm:$0xff] }
 0x152   :  { %v968_v26 = vld [vmem:[#allocation10 + $0x640] sm:$0xff]  ;;  %v3817_v29 = vcombine.high %v840_v24, %v844_v25  ;;  %v3816_v32 = vcombine.low %v840_v24, %v844_v25  ;;  %v3923_v24 = vcombine.high %v945_v16, %v949_v17  ;;  %v813_v25 = vld [vmem:[#allocation10 + $0x168] sm:$0xff] }
 0x153   :  { %v3944_v33 = vcombine.low %v968_v26, %v972_v31 }
 0x154   :  { %2359 = vmatpush1.bf16.msra.mxu1 %v3752_v34  ;;  %2400 = vmatpush1.bf16.msra.mxu0 %v3880_v35  ;;  %v3945_v34 = vcombine.high %v968_v26, %v972_v31  ;;  %v832_v35 = vld [vmem:[#allocation10 + $0x200] sm:$0xff]  ;;  %v937_v26 = vld [vmem:[#allocation10 + $0x548] sm:$0xff]  ;;  %v3794_v31 = vcombine.low %v817_v14, %v821_v15 }
 0x155   :  { %2360 = vmatprep.subr.bf16.mxu1 %v3745_v36  ;;  %2401 = vmatprep.subr.bf16.mxu0 %v3873_v37  ;;  %v836_v36 = vld [vmem:[#allocation10 + $0x220] sm:$0xff] }
 0x156   :  { %v960_v37 = vld [vmem:[#allocation10 + $0x600] sm:$0xff]  ;;  %v3809_v38 = vcombine.high %v832_v35, %v836_v36  ;;  %v3808_v40 = vcombine.low %v832_v35, %v836_v36  ;;  %v801_v35 = vld [vmem:[#allocation10 + $0x108] sm:$0xff] }
 0x157   :  { %v3936_v41 = vcombine.low %v960_v37, %v964_v39  ;;  %v805_v36 = vld [vmem:[#allocation10 + $0x128] sm:$0xff] }
 0x158   :  { %2361 = vmatpush1.bf16.msra.mxu1 %v3744_v42  ;;  %2402 = vmatpush1.bf16.msra.mxu0 %v3872_v43  ;;  %v3937_v42 = vcombine.high %v960_v37, %v964_v39  ;;  %v825_v43 = vld [vmem:[#allocation10 + $0x1c8] sm:$0xff] }
 0x159   :  { %2362 = vmatprep.subr.bf16.mxu1 %v3865_v44  ;;  %2403 = vmatprep.subr.bf16.mxu0 %v3993_v45  ;;  %v829_v44 = vld [vmem:[#allocation10 + $0x1e8] sm:$0xff] }
 0x15a   :  { %v953_v45 = vld [vmem:[#allocation10 + $0x5c8] sm:$0xff]  ;;  %v3803_v46 = vcombine.high %v825_v43, %v829_v44  ;;  %v3802_v48 = vcombine.low %v825_v43, %v829_v44 }
 0x15b   :  { %v3930_v49 = vcombine.low %v953_v45, %v957_v47  ;;  %v929_v37 = vld [vmem:[#allocation10 + $0x508] sm:$0xff] }
 0x15c   :  { %2363 = vmatpush2.bf16.msra.mxu1 %v3864_v50  ;;  %2404 = vmatpush2.bf16.msra.mxu0 %v3992_v51  ;;  %v3931_v50 = vcombine.high %v953_v45, %v957_v47  ;;  %v344_v51 = vsub.s32 2, %v4696_v27  ;;  %v793_v43 = vld [vmem:[#allocation10 + $0xc8] sm:$0xff]  ;;  %v3778_v47 = vcombine.low %v801_v35, %v805_v36 }
 0x15d   :  { %2364 = vmatprep.subr.bf16.mxu1 %v3857_v52  ;;  %2405 = vmatprep.subr.bf16.mxu0 %v3985_v53  ;;  %v332_v52 = vld [vmem:[#allocation8] sm:$0xf]  ;;  %v348_v53 = vsub.s32 3, %v4696_v27  ;;  %v797_v44 = vld [vmem:[#allocation10 + $0xe8] sm:$0xff] }
 0x15e   :  { %v337_v54 = vrot.slane %v332_v52, %v4699_v28  ;;  %v345_v55 = vrot.slane %v332_v52, %v344_v51  ;;  %v341_v56 = vrot.slane %v332_v52, %v4705_v30  ;;  %v921_v45 = vld [vmem:[#allocation10 + $0x4c8] sm:$0xff] }
 0x15f   :  { %v349_v57 = vrot.slane %v332_v52, %v348_v53  ;;  %v785_v52 = vld [vmem:[#allocation10 + $0x88] sm:$0xff] }
 0x160   :  { %2365 = vmatpush2.bf16.msra.mxu1 %v3856_v58  ;;  %2406 = vmatpush2.bf16.msra.mxu0 %v3984_v59 }
 0x161   :  { %2366 = vmatprep.subr.bf16.mxu1 %v3849_v60  ;;  %2407 = vmatprep.subr.bf16.mxu0 %v3977_v61 }
 0x164   :  { %2367 = vmatpush2.bf16.msra.mxu1 %v3848_v2  ;;  %2408 = vmatpush2.bf16.msra.mxu0 %v3976_v3 }
 0x165   :  { %2368 = vmatprep.subr.bf16.mxu1 %v3841_v4  ;;  %2409 = vmatprep.subr.bf16.mxu0 %v3969_v5 }
 0x168   :  { %2369 = vmatpush2.bf16.msra.mxu1 %v3840_v10  ;;  %2410 = vmatpush2.bf16.msra.mxu0 %v3968_v11 }
 0x169   :  { %2370 = vmatprep.subr.bf16.mxu1 %v3833_v12  ;;  %2411 = vmatprep.subr.bf16.mxu0 %v3961_v13 }
 0x16c   :  { %2371 = vmatpush2.bf16.msra.mxu1 %v3832_v18  ;;  %2412 = vmatpush2.bf16.msra.mxu0 %v3960_v19 }
 0x16d   :  { %2372 = vmatprep.subr.bf16.mxu1 %v3825_v20  ;;  %2413 = vmatprep.subr.bf16.mxu0 %v3953_v21 }
 0x170   :  { %2373 = vmatpush2.bf16.msra.mxu1 %v3824_v22  ;;  %2414 = vmatpush2.bf16.msra.mxu0 %v3952_v23  ;;  %v809_v22 = vld [vmem:[#allocation10 + $0x148] sm:$0xff]  ;;  %v3795_v23 = vcombine.high %v817_v14, %v821_v15 }
 0x171   :  { %2374 = vmatprep.subr.bf16.mxu1 %v3817_v29  ;;  %2415 = vmatprep.subr.bf16.mxu0 %v3945_v34  ;;  %v941_v29 = vld [vmem:[#allocation10 + $0x568] sm:$0xff]  ;;  %v3786_v39 = vcombine.low %v809_v22, %v813_v25 }
 0x172   :  { %v3915_v34 = vcombine.high %v937_v26, %v941_v29  ;;  %v893_v14 = vld [vmem:[#allocation10 + $0x3e8] sm:$0xff] }
 0x173   :  { %v1017_v15 = vld [vmem:[#allocation10 + $0x7c8] sm:$0xff] }
 0x174   :  { %2375 = vmatpush2.bf16.msra.mxu1 %v3816_v32  ;;  %2416 = vmatpush2.bf16.msra.mxu0 %v3944_v33  ;;  %v3922_v32 = vcombine.low %v945_v16, %v949_v17  ;;  %v3787_v33 = vcombine.high %v809_v22, %v813_v25  ;;  %v1021_v16 = vld [vmem:[#allocation10 + $0x7e8] sm:$0xff] }
 0x175   :  { %2376 = vmatprep.subr.bf16.mxu1 %v3809_v38  ;;  %2417 = vmatprep.subr.bf16.mxu0 %v3937_v42  ;;  %v933_v38 = vld [vmem:[#allocation10 + $0x528] sm:$0xff] }
 0x176   :  { %v3907_v42 = vcombine.high %v929_v37, %v933_v38  ;;  %v881_v25 = vld [vmem:[#allocation10 + $0x388] sm:$0xff] }
 0x178   :  { %2377 = vmatpush2.bf16.msra.mxu1 %v3808_v40  ;;  %2418 = vmatpush2.bf16.msra.mxu0 %v3936_v41  ;;  %v3914_v40 = vcombine.low %v937_v26, %v941_v29  ;;  %v3779_v41 = vcombine.high %v801_v35, %v805_v36  ;;  %v885_v26 = vld [vmem:[#allocation10 + $0x3a8] sm:$0xff] }
 0x179   :  { %2428 = vmatprep.subr.bf16.mxu1 %v3803_v46  ;;  %2469 = vmatprep.subr.bf16.mxu0 %v3931_v50  ;;  %v925_v46 = vld [vmem:[#allocation10 + $0x4e8] sm:$0xff] }
 0x17a   :  { %v3899_v50 = vcombine.high %v921_v45, %v925_v46  ;;  %v1009_v29 = vld [vmem:[#allocation10 + $0x788] sm:$0xff] }
 0x17b   :  { %v873_v36 = vld [vmem:[#allocation10 + $0x348] sm:$0xff] }
 0x1fb   :  { %v708_v58 = vpop.f32.mrf.mxu1  ;;  %v749_v59 = vpop.f32.mrf.mxu0 }
 0x1fc   :  { %v709_v60 = vadd.f32 %v708_v58, %v337_v54  ;;  %v750_v61 = vadd.f32 %v749_v59, %v345_v55  ;;  %v789_v54 = vld [vmem:[#allocation10 + $0xa8] sm:$0xff]  ;;  %v3898_v58 = vcombine.low %v921_v45, %v925_v46 }
 0x1fd   :  { %v710_v62 = vpop.f32.mrf.mxu1  ;;  %v751_v63 = vpop.f32.mrf.mxu0  ;;  %v913_v55 = vld [vmem:[#allocation10 + $0x488] sm:$0xff]  ;;  %v3763_v59 = vcombine.high %v785_v52, %v789_v54 }
 0x1fe   :  { %v756_v0 = vmul.f32 0.2, %v709_v60  ;;  %v758_v1 = vmul.f32 0.2, %v750_v61  ;;  %v711_v2 = vadd.f32 %v710_v62, %v341_v56  ;;  %v752_v3 = vadd.f32 %v751_v63, %v349_v57  ;;  %v917_v56 = vld [vmem:[#allocation10 + $0x4a8] sm:$0xff] }
 0x1ff   :  { %v712_v4 = vpop.f32.mrf.mxu1  ;;  %v753_v5 = vpop.f32.mrf.mxu0  ;;  %v3770_v57 = vcombine.low %v793_v43, %v797_v44  ;;  %v781_v62 = vld [vmem:[#allocation10 + $0x68] sm:$0xff] }
 0x200   :  { %v757_v6 = vmul.f32 0.2, %v711_v2  ;;  %v759_v7 = vmul.f32 0.2, %v752_v3  ;;  %v760_v8 = vmax.f32 %v709_v60, %v756_v0  ;;  %v762_v9 = vmax.f32 %v750_v61, %v758_v1  ;;  %v777_v61 = vld [vmem:[#allocation10 + $0x48] sm:$0xff] }
 0x201   :  { %v713_v10 = vpop.f32.mrf.mxu1  ;;  %v754_v11 = vpop.f32.mrf.mxu0  ;;  %v3891_v60 = vcombine.high %v913_v55, %v917_v56  ;;  %v905_v63 = vld [vmem:[#allocation10 + $0x448] sm:$0xff]  ;;  %v3762_v1 = vcombine.low %v785_v52, %v789_v54 }
 0x202   :  { %v761_v12 = vmax.f32 %v711_v2, %v757_v6  ;;  %v763_v13 = vmax.f32 %v752_v3, %v759_v7  ;;  %v4721_v20 = vpack.c.bf16 %v760_v8, %v760_v8  ;;  %v4723_v21 = vpack.c.bf16 %v762_v9, %v762_v9  ;;  %v909_v0 = vld [vmem:[#allocation10 + $0x468] sm:$0xff] }
 0x203   :  { %v3890_v2 = vcombine.low %v913_v55, %v917_v56  ;;  %v3755_v3 = vcombine.high %v777_v61, %v781_v62  ;;  %v3883_v4 = vcombine.high %v905_v63, %v909_v0  ;;  %v769_v5 = vld [vmem:[#allocation10 + $0x8] sm:$0xff]  ;;  %v3754_v9 = vcombine.low %v777_v61, %v781_v62 }
 0x204   :  { %v4717_v18 = vpack.c.bf16 %v761_v12, %v761_v12  ;;  %v4719_v19 = vpack.c.bf16 %v763_v13, %v763_v13  ;;  %v773_v6 = vld [vmem:[#allocation10 + $0x28] sm:$0xff]  ;;  %v3882_v10 = vcombine.low %v905_v63, %v909_v0 }
 0x205   :  { %v897_v7 = vld [vmem:[#allocation10 + $0x408] sm:$0xff]  ;;  %v3747_v11 = vcombine.high %v769_v5, %v773_v6  ;;  %v3746_v17 = vcombine.low %v769_v5, %v773_v6 }
 0x206   :  { %2378 = vmatprep.mubr.bf16.mxu1 %v4717_v18  ;;  %2419 = vmatprep.mubr.bf16.mxu0 %v4719_v19  ;;  %v901_v8 = vld [vmem:[#allocation10 + $0x428] sm:$0xff] }
 0x207   :  { %2379 = vmatmul.mubr.bf16.vlgmr.msra.gmra.mxu1 %v4721_v20  ;;  %2420 = vmatmul.mubr.bf16.vlgmr.msra.gmra.mxu0 %v4723_v21  ;;  %v3875_v12 = vcombine.high %v897_v7, %v901_v8  ;;  %v889_v13 = vld [vmem:[#allocation10 + $0x3c8] sm:$0xff]  ;;  %v3874_v22 = vcombine.low %v897_v7, %v901_v8 }
 0x208   :  { %2429 = vmatpush1.bf16.msra.mxu1 %v3802_v48  ;;  %2470 = vmatpush1.bf16.msra.mxu0 %v3930_v49  ;;  %v3906_v48 = vcombine.low %v929_v37, %v933_v38  ;;  %v3771_v49 = vcombine.high %v793_v43, %v797_v44  ;;  %v877_v37 = vld [vmem:[#allocation10 + $0x368] sm:$0xff] }
 0x209   :  { %2460 = vmatprep.mubr.bf16.mxu1 %v4717_v18  ;;  %2501 = vmatprep.mubr.bf16.mxu0 %v4719_v19  ;;  %v1001_v38 = vld [vmem:[#allocation10 + $0x748] sm:$0xff] }
 0x20a   :  { %2430 = vmatprep.subr.bf16.mxu1 %v3795_v23  ;;  %2471 = vmatprep.subr.bf16.mxu0 %v3923_v24  ;;  %v3867_v23 = vcombine.high %v889_v13, %v893_v14  ;;  %v3995_v24 = vcombine.high %v1017_v15, %v1021_v16  ;;  %v865_v44 = vld [vmem:[#allocation10 + $0x308] sm:$0xff] }
 0x20b   :  { %v869_v45 = vld [vmem:[#allocation10 + $0x328] sm:$0xff] }
 0x20c   :  { %2431 = vmatpush1.bf16.msra.mxu1 %v3794_v31  ;;  %2472 = vmatpush1.bf16.msra.mxu0 %v3922_v32  ;;  %v1013_v31 = vld [vmem:[#allocation10 + $0x7a8] sm:$0xff]  ;;  %v3866_v32 = vcombine.low %v889_v13, %v893_v14 }
 0x20d   :  { %2432 = vmatprep.subr.bf16.mxu1 %v3787_v33  ;;  %2473 = vmatprep.subr.bf16.mxu0 %v3915_v34  ;;  %v3994_v33 = vcombine.low %v1017_v15, %v1021_v16  ;;  %v3859_v34 = vcombine.high %v881_v25, %v885_v26  ;;  %v3987_v35 = vcombine.high %v1009_v29, %v1013_v31  ;;  %v993_v46 = vld [vmem:[#allocation10 + $0x708] sm:$0xff] }
 0x20e   :  { %v857_v54 = vld [vmem:[#allocation10 + $0x2c8] sm:$0xff] }
 0x20f   :  { %v861_v55 = vld [vmem:[#allocation10 + $0x2e8] sm:$0xff] }
 0x210   :  { %2433 = vmatpush1.bf16.msra.mxu1 %v3786_v39  ;;  %2474 = vmatpush1.bf16.msra.mxu0 %v3914_v40  ;;  %v1005_v39 = vld [vmem:[#allocation10 + $0x768] sm:$0xff]  ;;  %v3858_v40 = vcombine.low %v881_v25, %v885_v26  ;;  %v826_v26 = vld [vmem:[#allocation10 + $0x1d0] sm:$0xff] }
 0x211   :  { %2434 = vmatprep.subr.bf16.mxu1 %v3779_v41  ;;  %2475 = vmatprep.subr.bf16.mxu0 %v3907_v42  ;;  %v3986_v41 = vcombine.low %v1009_v29, %v1013_v31  ;;  %v3851_v42 = vcombine.high %v873_v36, %v877_v37  ;;  %v3979_v43 = vcombine.high %v1001_v38, %v1005_v39  ;;  %v985_v56 = vld [vmem:[#allocation10 + $0x6c8] sm:$0xff]  ;;  %v830_v29 = vld [vmem:[#allocation10 + $0x1f0] sm:$0xff] }
 0x212   :  { %v849_v62 = vld [vmem:[#allocation10 + $0x288] sm:$0xff]  ;;  %v954_v31 = vld [vmem:[#allocation10 + $0x5d0] sm:$0xff] }
 0x213   :  { %v853_v63 = vld [vmem:[#allocation10 + $0x2a8] sm:$0xff] }
 0x214   :  { %2435 = vmatpush1.bf16.msra.mxu1 %v3778_v47  ;;  %2476 = vmatpush1.bf16.msra.mxu0 %v3906_v48  ;;  %v997_v47 = vld [vmem:[#allocation10 + $0x728] sm:$0xff]  ;;  %v3850_v48 = vcombine.low %v873_v36, %v877_v37  ;;  %v818_v37 = vld [vmem:[#allocation10 + $0x190] sm:$0xff] }
 0x215   :  { %2436 = vmatprep.subr.bf16.mxu1 %v3771_v49  ;;  %2477 = vmatprep.subr.bf16.mxu0 %v3899_v50  ;;  %v3978_v49 = vcombine.low %v1001_v38, %v1005_v39  ;;  %v3843_v50 = vcombine.high %v865_v44, %v869_v45  ;;  %v3971_v52 = vcombine.high %v993_v46, %v997_v47  ;;  %v977_v0 = vld [vmem:[#allocation10 + $0x688] sm:$0xff]  ;;  %v822_v38 = vld [vmem:[#allocation10 + $0x1b0] sm:$0xff] }
 0x216   :  { %v841_v6 = vld [vmem:[#allocation10 + $0x248] sm:$0xff]  ;;  %v946_v39 = vld [vmem:[#allocation10 + $0x590] sm:$0xff] }
 0x217   :  { %v845_v7 = vld [vmem:[#allocation10 + $0x268] sm:$0xff] }
 0x218   :  { %2437 = vmatpush1.bf16.msra.mxu1 %v3770_v57  ;;  %2478 = vmatpush1.bf16.msra.mxu0 %v3898_v58  ;;  %v989_v57 = vld [vmem:[#allocation10 + $0x6e8] sm:$0xff]  ;;  %v3842_v58 = vcombine.low %v865_v44, %v869_v45  ;;  %v810_v45 = vld [vmem:[#allocation10 + $0x150] sm:$0xff] }
 0x219   :  { %2438 = vmatprep.subr.bf16.mxu1 %v3763_v59  ;;  %2479 = vmatprep.subr.bf16.mxu0 %v3891_v60  ;;  %v3970_v59 = vcombine.low %v993_v46, %v997_v47  ;;  %v3835_v60 = vcombine.high %v857_v54, %v861_v55  ;;  %v3963_v61 = vcombine.high %v985_v56, %v989_v57  ;;  %v969_v8 = vld [vmem:[#allocation10 + $0x648] sm:$0xff]  ;;  %v814_v46 = vld [vmem:[#allocation10 + $0x170] sm:$0xff] }
 0x21a   :  { %v833_v14 = vld [vmem:[#allocation10 + $0x208] sm:$0xff]  ;;  %v938_v47 = vld [vmem:[#allocation10 + $0x550] sm:$0xff] }
 0x21b   :  { %v837_v15 = vld [vmem:[#allocation10 + $0x228] sm:$0xff] }
 0x21c   :  { %2439 = vmatpush1.bf16.msra.mxu1 %v3762_v1  ;;  %2480 = vmatpush1.bf16.msra.mxu0 %v3890_v2  ;;  %v981_v1 = vld [vmem:[#allocation10 + $0x6a8] sm:$0xff]  ;;  %v3834_v2 = vcombine.low %v857_v54, %v861_v55  ;;  %v802_v55 = vld [vmem:[#allocation10 + $0x110] sm:$0xff] }
 0x21d   :  { %2440 = vmatprep.subr.bf16.mxu1 %v3755_v3  ;;  %2481 = vmatprep.subr.bf16.mxu0 %v3883_v4  ;;  %v3962_v3 = vcombine.low %v985_v56, %v989_v57  ;;  %v3827_v4 = vcombine.high %v849_v62, %v853_v63  ;;  %v3955_v5 = vcombine.high %v977_v0, %v981_v1  ;;  %v961_v16 = vld [vmem:[#allocation10 + $0x608] sm:$0xff]  ;;  %v806_v56 = vld [vmem:[#allocation10 + $0x130] sm:$0xff] }
 0x21e   :  { %v930_v57 = vld [vmem:[#allocation10 + $0x510] sm:$0xff] }
 0x220   :  { %2441 = vmatpush1.bf16.msra.mxu1 %v3754_v9  ;;  %2482 = vmatpush1.bf16.msra.mxu0 %v3882_v10  ;;  %v973_v9 = vld [vmem:[#allocation10 + $0x668] sm:$0xff]  ;;  %v3826_v10 = vcombine.low %v849_v62, %v853_v63  ;;  %v794_v63 = vld [vmem:[#allocation10 + $0xd0] sm:$0xff] }
 0x221   :  { %2442 = vmatprep.subr.bf16.mxu1 %v3747_v11  ;;  %2483 = vmatprep.subr.bf16.mxu0 %v3875_v12  ;;  %v3954_v11 = vcombine.low %v977_v0, %v981_v1  ;;  %v3819_v12 = vcombine.high %v841_v6, %v845_v7  ;;  %v3947_v13 = vcombine.high %v969_v8, %v973_v9  ;;  %v798_v0 = vld [vmem:[#allocation10 + $0xf0] sm:$0xff] }
 0x222   :  { %v922_v1 = vld [vmem:[#allocation10 + $0x4d0] sm:$0xff] }
 0x224   :  { %2443 = vmatpush1.bf16.msra.mxu1 %v3746_v17  ;;  %2484 = vmatpush1.bf16.msra.mxu0 %v3874_v22  ;;  %v965_v17 = vld [vmem:[#allocation10 + $0x628] sm:$0xff]  ;;  %v3818_v22 = vcombine.low %v841_v6, %v845_v7  ;;  %v786_v7 = vld [vmem:[#allocation10 + $0x90] sm:$0xff] }
 0x225   :  { %2444 = vmatprep.subr.bf16.mxu1 %v3867_v23  ;;  %2485 = vmatprep.subr.bf16.mxu0 %v3995_v24  ;;  %v3946_v23 = vcombine.low %v969_v8, %v973_v9  ;;  %v3811_v24 = vcombine.high %v833_v14, %v837_v15  ;;  %v3939_v25 = vcombine.high %v961_v16, %v965_v17  ;;  %v790_v8 = vld [vmem:[#allocation10 + $0xb0] sm:$0xff] }
 0x226   :  { %v914_v9 = vld [vmem:[#allocation10 + $0x490] sm:$0xff] }
 0x228   :  { %2445 = vmatpush2.bf16.msra.mxu1 %v3866_v32  ;;  %2486 = vmatpush2.bf16.msra.mxu0 %v3994_v33  ;;  %v958_v32 = vld [vmem:[#allocation10 + $0x5f0] sm:$0xff]  ;;  %v3810_v33 = vcombine.low %v833_v14, %v837_v15 }
 0x229   :  { %2446 = vmatprep.subr.bf16.mxu1 %v3859_v34  ;;  %2487 = vmatprep.subr.bf16.mxu0 %v3987_v35  ;;  %v3938_v34 = vcombine.low %v961_v16, %v965_v17  ;;  %v3805_v35 = vcombine.high %v826_v26, %v830_v29  ;;  %v3933_v36 = vcombine.high %v954_v31, %v958_v32  ;;  %v778_v15 = vld [vmem:[#allocation10 + $0x50] sm:$0xff] }
 0x22a   :  { %v782_v16 = vld [vmem:[#allocation10 + $0x70] sm:$0xff] }
 0x22b   :  { %v906_v17 = vld [vmem:[#allocation10 + $0x450] sm:$0xff] }
 0x22c   :  { %2447 = vmatpush2.bf16.msra.mxu1 %v3858_v40  ;;  %2488 = vmatpush2.bf16.msra.mxu0 %v3986_v41  ;;  %v950_v40 = vld [vmem:[#allocation10 + $0x5b0] sm:$0xff]  ;;  %v3804_v41 = vcombine.low %v826_v26, %v830_v29 }
 0x22d   :  { %2448 = vmatprep.subr.bf16.mxu1 %v3851_v42  ;;  %2489 = vmatprep.subr.bf16.mxu0 %v3979_v43  ;;  %v3932_v42 = vcombine.low %v954_v31, %v958_v32  ;;  %v3797_v43 = vcombine.high %v818_v37, %v822_v38  ;;  %v3925_v44 = vcombine.high %v946_v39, %v950_v40  ;;  %v770_v29 = vld [vmem:[#allocation10 + $0x10] sm:$0xff] }
 0x22e   :  { %v774_v31 = vld [vmem:[#allocation10 + $0x30] sm:$0xff] }
 0x22f   :  { %v898_v32 = vld [vmem:[#allocation10 + $0x410] sm:$0xff] }
 0x230   :  { %2449 = vmatpush2.bf16.msra.mxu1 %v3850_v48  ;;  %2490 = vmatpush2.bf16.msra.mxu0 %v3978_v49  ;;  %v942_v48 = vld [vmem:[#allocation10 + $0x570] sm:$0xff]  ;;  %v3796_v49 = vcombine.low %v818_v37, %v822_v38 }
 0x231   :  { %2450 = vmatprep.subr.bf16.mxu1 %v3843_v50  ;;  %2491 = vmatprep.subr.bf16.mxu0 %v3971_v52  ;;  %v3924_v50 = vcombine.low %v946_v39, %v950_v40  ;;  %v3789_v52 = vcombine.high %v810_v45, %v814_v46  ;;  %v3917_v54 = vcombine.high %v938_v47, %v942_v48  ;;  %v890_v38 = vld [vmem:[#allocation10 + $0x3d0] sm:$0xff] }
 0x232   :  { %v894_v39 = vld [vmem:[#allocation10 + $0x3f0] sm:$0xff] }
 0x233   :  { %v1018_v40 = vld [vmem:[#allocation10 + $0x7d0] sm:$0xff] }
 0x234   :  { %2451 = vmatpush2.bf16.msra.mxu1 %v3842_v58  ;;  %2492 = vmatpush2.bf16.msra.mxu0 %v3970_v59  ;;  %v934_v58 = vld [vmem:[#allocation10 + $0x530] sm:$0xff]  ;;  %v3788_v59 = vcombine.low %v810_v45, %v814_v46 }
 0x235   :  { %2452 = vmatprep.subr.bf16.mxu1 %v3835_v60  ;;  %2493 = vmatprep.subr.bf16.mxu0 %v3963_v61  ;;  %v3916_v60 = vcombine.low %v938_v47, %v942_v48  ;;  %v3781_v61 = vcombine.high %v802_v55, %v806_v56  ;;  %v3909_v62 = vcombine.high %v930_v57, %v934_v58  ;;  %v882_v46 = vld [vmem:[#allocation10 + $0x390] sm:$0xff] }
 0x236   :  { %v886_v47 = vld [vmem:[#allocation10 + $0x3b0] sm:$0xff] }
 0x237   :  { %v1010_v48 = vld [vmem:[#allocation10 + $0x790] sm:$0xff] }
 0x238   :  { %2453 = vmatpush2.bf16.msra.mxu1 %v3834_v2  ;;  %2494 = vmatpush2.bf16.msra.mxu0 %v3962_v3  ;;  %v926_v2 = vld [vmem:[#allocation10 + $0x4f0] sm:$0xff]  ;;  %v3780_v3 = vcombine.low %v802_v55, %v806_v56 }
 0x239   :  { %2454 = vmatprep.subr.bf16.mxu1 %v3827_v4  ;;  %2495 = vmatprep.subr.bf16.mxu0 %v3955_v5  ;;  %v3908_v4 = vcombine.low %v930_v57, %v934_v58  ;;  %v3773_v5 = vcombine.high %v794_v63, %v798_v0  ;;  %v3901_v6 = vcombine.high %v922_v1, %v926_v2  ;;  %v874_v56 = vld [vmem:[#allocation10 + $0x350] sm:$0xff] }
 0x23a   :  { %v878_v57 = vld [vmem:[#allocation10 + $0x370] sm:$0xff] }
 0x23b   :  { %v1002_v58 = vld [vmem:[#allocation10 + $0x750] sm:$0xff] }
 0x23c   :  { %2455 = vmatpush2.bf16.msra.mxu1 %v3826_v10  ;;  %2496 = vmatpush2.bf16.msra.mxu0 %v3954_v11  ;;  %v918_v10 = vld [vmem:[#allocation10 + $0x4b0] sm:$0xff]  ;;  %v3772_v11 = vcombine.low %v794_v63, %v798_v0 }
 0x23d   :  { %2456 = vmatprep.subr.bf16.mxu1 %v3819_v12  ;;  %2497 = vmatprep.subr.bf16.mxu0 %v3947_v13  ;;  %v3900_v12 = vcombine.low %v922_v1, %v926_v2  ;;  %v3765_v13 = vcombine.high %v786_v7, %v790_v8  ;;  %v3893_v14 = vcombine.high %v914_v9, %v918_v10  ;;  %v866_v0 = vld [vmem:[#allocation10 + $0x310] sm:$0xff] }
 0x23e   :  { %v870_v1 = vld [vmem:[#allocation10 + $0x330] sm:$0xff] }
 0x23f   :  { %v994_v2 = vld [vmem:[#allocation10 + $0x710] sm:$0xff] }
 0x240   :  { %2457 = vmatpush2.bf16.msra.mxu1 %v3818_v22  ;;  %2498 = vmatpush2.bf16.msra.mxu0 %v3946_v23  ;;  %v910_v22 = vld [vmem:[#allocation10 + $0x470] sm:$0xff]  ;;  %v3764_v23 = vcombine.low %v786_v7, %v790_v8 }
 0x241   :  { %2458 = vmatprep.subr.bf16.mxu1 %v3811_v24  ;;  %2499 = vmatprep.subr.bf16.mxu0 %v3939_v25  ;;  %v3892_v24 = vcombine.low %v914_v9, %v918_v10  ;;  %v3757_v25 = vcombine.high %v778_v15, %v782_v16  ;;  %v3885_v26 = vcombine.high %v906_v17, %v910_v22  ;;  %v858_v8 = vld [vmem:[#allocation10 + $0x2d0] sm:$0xff] }
 0x242   :  { %v862_v9 = vld [vmem:[#allocation10 + $0x2f0] sm:$0xff] }
 0x243   :  { %v986_v10 = vld [vmem:[#allocation10 + $0x6d0] sm:$0xff] }
 0x244   :  { %2459 = vmatpush2.bf16.msra.mxu1 %v3810_v33  ;;  %2500 = vmatpush2.bf16.msra.mxu0 %v3938_v34  ;;  %v902_v33 = vld [vmem:[#allocation10 + $0x430] sm:$0xff]  ;;  %v3756_v34 = vcombine.low %v778_v15, %v782_v16 }
 0x245   :  { %2510 = vmatprep.subr.bf16.mxu1 %v3805_v35  ;;  %2551 = vmatprep.subr.bf16.mxu0 %v3933_v36  ;;  %v3884_v35 = vcombine.low %v906_v17, %v910_v22  ;;  %v3749_v36 = vcombine.high %v770_v29, %v774_v31  ;;  %v3877_v37 = vcombine.high %v898_v32, %v902_v33  ;;  %v850_v16 = vld [vmem:[#allocation10 + $0x290] sm:$0xff] }
 0x246   :  { %v854_v17 = vld [vmem:[#allocation10 + $0x2b0] sm:$0xff] }
 0x247   :  { %2461 = vmatmul.mubr.bf16.vlgmr.msra.gmra.mxu1 %v4721_v20  ;;  %2502 = vmatmul.mubr.bf16.vlgmr.msra.gmra.mxu0 %v4723_v21  ;;  %v978_v22 = vld [vmem:[#allocation10 + $0x690] sm:$0xff] }
 0x248   :  { %2511 = vmatpush1.bf16.msra.mxu1 %v3804_v41  ;;  %2542 = vmatprep.mubr.bf16.mxu1 %v4717_v18  ;;  %v1022_v41 = vld [vmem:[#allocation10 + $0x7f0] sm:$0xff] }
 0x249   :  { %2552 = vmatpush1.bf16.msra.mxu0 %v3932_v42  ;;  %2583 = vmatprep.mubr.bf16.mxu0 %v4719_v19  ;;  %v3748_v42 = vcombine.low %v770_v29, %v774_v31  ;;  %v3997_v45 = vcombine.high %v1018_v40, %v1022_v41  ;;  %v842_v31 = vld [vmem:[#allocation10 + $0x250] sm:$0xff] }
 0x24a   :  { %2512 = vmatprep.subr.bf16.mxu1 %v3797_v43  ;;  %2553 = vmatprep.subr.bf16.mxu0 %v3925_v44  ;;  %v3876_v43 = vcombine.low %v898_v32, %v902_v33  ;;  %v3869_v44 = vcombine.high %v890_v38, %v894_v39  ;;  %v846_v32 = vld [vmem:[#allocation10 + $0x270] sm:$0xff] }
 0x24b   :  { %v970_v33 = vld [vmem:[#allocation10 + $0x650] sm:$0xff] }
 0x24c   :  { %2513 = vmatpush1.bf16.msra.mxu1 %v3796_v49  ;;  %v1014_v49 = vld [vmem:[#allocation10 + $0x7b0] sm:$0xff] }
 0x24d   :  { %2554 = vmatpush1.bf16.msra.mxu0 %v3924_v50  ;;  %2514 = vmatprep.subr.bf16.mxu1 %v3789_v52  ;;  %v3868_v50 = vcombine.low %v890_v38, %v894_v39  ;;  %v3996_v52 = vcombine.low %v1018_v40, %v1022_v41  ;;  %v3989_v55 = vcombine.high %v1010_v48, %v1014_v49  ;;  %v834_v39 = vld [vmem:[#allocation10 + $0x210] sm:$0xff] }
 0x24e   :  { %2555 = vmatprep.subr.bf16.mxu0 %v3917_v54  ;;  %v3861_v54 = vcombine.high %v882_v46, %v886_v47  ;;  %v838_v40 = vld [vmem:[#allocation10 + $0x230] sm:$0xff] }
 0x24f   :  { %v962_v41 = vld [vmem:[#allocation10 + $0x610] sm:$0xff] }
 0x250   :  { %2515 = vmatpush1.bf16.msra.mxu1 %v3788_v59  ;;  %v1006_v59 = vld [vmem:[#allocation10 + $0x770] sm:$0xff] }
 0x251   :  { %2556 = vmatpush1.bf16.msra.mxu0 %v3916_v60  ;;  %2516 = vmatprep.subr.bf16.mxu1 %v3781_v61  ;;  %v3860_v60 = vcombine.low %v882_v46, %v886_v47  ;;  %v3988_v61 = vcombine.low %v1010_v48, %v1014_v49  ;;  %v3981_v63 = vcombine.high %v1002_v58, %v1006_v59  ;;  %v827_v47 = vld [vmem:[#allocation10 + $0x1d8] sm:$0xff] }
 0x252   :  { %2557 = vmatprep.subr.bf16.mxu0 %v3909_v62  ;;  %v3853_v62 = vcombine.high %v874_v56, %v878_v57  ;;  %v831_v48 = vld [vmem:[#allocation10 + $0x1f8] sm:$0xff] }
 0x253   :  { %v955_v49 = vld [vmem:[#allocation10 + $0x5d8] sm:$0xff] }
 0x254   :  { %2517 = vmatpush1.bf16.msra.mxu1 %v3780_v3  ;;  %v998_v3 = vld [vmem:[#allocation10 + $0x730] sm:$0xff] }
 0x255   :  { %2558 = vmatpush1.bf16.msra.mxu0 %v3908_v4  ;;  %2518 = vmatprep.subr.bf16.mxu1 %v3773_v5  ;;  %v3852_v4 = vcombine.low %v874_v56, %v878_v57  ;;  %v3980_v5 = vcombine.low %v1002_v58, %v1006_v59  ;;  %v3973_v7 = vcombine.high %v994_v2, %v998_v3  ;;  %v819_v57 = vld [vmem:[#allocation10 + $0x198] sm:$0xff] }
 0x256   :  { %2559 = vmatprep.subr.bf16.mxu0 %v3901_v6  ;;  %v3845_v6 = vcombine.high %v866_v0, %v870_v1  ;;  %v823_v58 = vld [vmem:[#allocation10 + $0x1b8] sm:$0xff]  ;;  %v3806_v59 = vcombine.low %v827_v47, %v831_v48 }
 0x258   :  { %2519 = vmatpush1.bf16.msra.mxu1 %v3772_v11  ;;  %v990_v11 = vld [vmem:[#allocation10 + $0x6f0] sm:$0xff] }
 0x259   :  { %2560 = vmatpush1.bf16.msra.mxu0 %v3900_v12  ;;  %2520 = vmatprep.subr.bf16.mxu1 %v3765_v13  ;;  %v3844_v12 = vcombine.low %v866_v0, %v870_v1  ;;  %v3972_v13 = vcombine.low %v994_v2, %v998_v3  ;;  %v3965_v15 = vcombine.high %v986_v10, %v990_v11  ;;  %v811_v0 = vld [vmem:[#allocation10 + $0x158] sm:$0xff] }
 0x25a   :  { %2561 = vmatprep.subr.bf16.mxu0 %v3893_v14  ;;  %v3837_v14 = vcombine.high %v858_v8, %v862_v9  ;;  %v815_v1 = vld [vmem:[#allocation10 + $0x178] sm:$0xff] }
 0x25b   :  { %v939_v3 = vld [vmem:[#allocation10 + $0x558] sm:$0xff] }
 0x25c   :  { %2521 = vmatpush1.bf16.msra.mxu1 %v3764_v23  ;;  %v982_v23 = vld [vmem:[#allocation10 + $0x6b0] sm:$0xff] }
 0x25d   :  { %2562 = vmatpush1.bf16.msra.mxu0 %v3892_v24  ;;  %2522 = vmatprep.subr.bf16.mxu1 %v3757_v25  ;;  %v3836_v24 = vcombine.low %v858_v8, %v862_v9  ;;  %v3964_v25 = vcombine.low %v986_v10, %v990_v11  ;;  %v3957_v29 = vcombine.high %v978_v22, %v982_v23  ;;  %v803_v9 = vld [vmem:[#allocation10 + $0x118] sm:$0xff] }
 0x25e   :  { %2563 = vmatprep.subr.bf16.mxu0 %v3885_v26  ;;  %v3829_v26 = vcombine.high %v850_v16, %v854_v17  ;;  %v807_v10 = vld [vmem:[#allocation10 + $0x138] sm:$0xff] }
 0x25f   :  { %v931_v11 = vld [vmem:[#allocation10 + $0x518] sm:$0xff] }
 0x260   :  { %2523 = vmatpush1.bf16.msra.mxu1 %v3756_v34  ;;  %v974_v34 = vld [vmem:[#allocation10 + $0x670] sm:$0xff] }
 0x261   :  { %2564 = vmatpush1.bf16.msra.mxu0 %v3884_v35  ;;  %2524 = vmatprep.subr.bf16.mxu1 %v3749_v36  ;;  %v3828_v35 = vcombine.low %v850_v16, %v854_v17  ;;  %v3956_v36 = vcombine.low %v978_v22, %v982_v23  ;;  %v3949_v38 = vcombine.high %v970_v33, %v974_v34  ;;  %v795_v16 = vld [vmem:[#allocation10 + $0xd8] sm:$0xff] }
 0x262   :  { %2565 = vmatprep.subr.bf16.mxu0 %v3877_v37  ;;  %v3821_v37 = vcombine.high %v842_v31, %v846_v32  ;;  %v799_v17 = vld [vmem:[#allocation10 + $0xf8] sm:$0xff] }
 0x263   :  { %v923_v22 = vld [vmem:[#allocation10 + $0x4d8] sm:$0xff] }
 0x264   :  { %2525 = vmatpush1.bf16.msra.mxu1 %v3748_v42  ;;  %v966_v42 = vld [vmem:[#allocation10 + $0x630] sm:$0xff]  ;;  %v927_v23 = vld [vmem:[#allocation10 + $0x4f8] sm:$0xff] }
 0x265   :  { %2566 = vmatpush1.bf16.msra.mxu0 %v3876_v43  ;;  %2526 = vmatprep.subr.bf16.mxu1 %v3869_v44  ;;  %v3820_v43 = vcombine.low %v842_v31, %v846_v32  ;;  %v3948_v44 = vcombine.low %v970_v33, %v974_v34  ;;  %v3941_v46 = vcombine.high %v962_v41, %v966_v42  ;;  %v791_v31 = vld [vmem:[#allocation10 + $0xb8] sm:$0xff] }
 0x266   :  { %2567 = vmatprep.subr.bf16.mxu0 %v3997_v45  ;;  %v3813_v45 = vcombine.high %v834_v39, %v838_v40  ;;  %v915_v32 = vld [vmem:[#allocation10 + $0x498] sm:$0xff]  ;;  %v3774_v34 = vcombine.low %v795_v16, %v799_v17 }
 0x267   :  { %v919_v33 = vld [vmem:[#allocation10 + $0x4b8] sm:$0xff] }
 0x268   :  { %2527 = vmatpush2.bf16.msra.mxu1 %v3868_v50  ;;  %v959_v50 = vld [vmem:[#allocation10 + $0x5f8] sm:$0xff] }
 0x269   :  { %2568 = vmatpush2.bf16.msra.mxu0 %v3996_v52  ;;  %2528 = vmatprep.subr.bf16.mxu1 %v3861_v54  ;;  %v3812_v52 = vcombine.low %v834_v39, %v838_v40  ;;  %v3940_v54 = vcombine.low %v962_v41, %v966_v42  ;;  %v3935_v56 = vcombine.high %v955_v49, %v959_v50  ;;  %v783_v39 = vld [vmem:[#allocation10 + $0x78] sm:$0xff] }
 0x26a   :  { %2569 = vmatprep.subr.bf16.mxu0 %v3989_v55  ;;  %v3807_v55 = vcombine.high %v827_v47, %v831_v48  ;;  %v907_v40 = vld [vmem:[#allocation10 + $0x458] sm:$0xff] }
 0x26b   :  { %v911_v41 = vld [vmem:[#allocation10 + $0x478] sm:$0xff] }
 0x26c   :  { %2529 = vmatpush2.bf16.msra.mxu1 %v3860_v60  ;;  %v947_v60 = vld [vmem:[#allocation10 + $0x598] sm:$0xff] }
 0x26d   :  { %2570 = vmatpush2.bf16.msra.mxu0 %v3988_v61  ;;  %2530 = vmatprep.subr.bf16.mxu1 %v3853_v62  ;;  %v951_v61 = vld [vmem:[#allocation10 + $0x5b8] sm:$0xff]  ;;  %v3934_v62 = vcombine.low %v955_v49, %v959_v50 }
 0x26e   :  { %2571 = vmatprep.subr.bf16.mxu0 %v3981_v63  ;;  %v3799_v63 = vcombine.high %v819_v57, %v823_v58  ;;  %v3927_v2 = vcombine.high %v947_v60, %v951_v61  ;;  %v775_v47 = vld [vmem:[#allocation10 + $0x38] sm:$0xff] }
 0x26f   :  { %v899_v48 = vld [vmem:[#allocation10 + $0x418] sm:$0xff] }
 0x270   :  { %2531 = vmatpush2.bf16.msra.mxu1 %v3852_v4  ;;  %v943_v4 = vld [vmem:[#allocation10 + $0x578] sm:$0xff] }
 0x271   :  { %2572 = vmatpush2.bf16.msra.mxu0 %v3980_v5  ;;  %2532 = vmatprep.subr.bf16.mxu1 %v3845_v6  ;;  %v3798_v5 = vcombine.low %v819_v57, %v823_v58  ;;  %v3926_v6 = vcombine.low %v947_v60, %v951_v61  ;;  %v3919_v8 = vcombine.high %v939_v3, %v943_v4  ;;  %v903_v49 = vld [vmem:[#allocation10 + $0x438] sm:$0xff] }
 0x272   :  { %2573 = vmatprep.subr.bf16.mxu0 %v3973_v7  ;;  %v3791_v7 = vcombine.high %v811_v0, %v815_v1  ;;  %v895_v57 = vld [vmem:[#allocation10 + $0x3f8] sm:$0xff]  ;;  %v3878_v61 = vcombine.low %v899_v48, %v903_v49 }
 0x273   :  { %v1019_v58 = vld [vmem:[#allocation10 + $0x7d8] sm:$0xff] }
 0x274   :  { %2533 = vmatpush2.bf16.msra.mxu1 %v3844_v12  ;;  %v935_v12 = vld [vmem:[#allocation10 + $0x538] sm:$0xff] }
 0x275   :  { %2574 = vmatpush2.bf16.msra.mxu0 %v3972_v13  ;;  %2534 = vmatprep.subr.bf16.mxu1 %v3837_v14  ;;  %v3790_v13 = vcombine.low %v811_v0, %v815_v1  ;;  %v3918_v14 = vcombine.low %v939_v3, %v943_v4  ;;  %v883_v0 = vld [vmem:[#allocation10 + $0x398] sm:$0xff] }
 0x276   :  { %2575 = vmatprep.subr.bf16.mxu0 %v3965_v15  ;;  %v3783_v15 = vcombine.high %v803_v9, %v807_v10  ;;  %v887_v1 = vld [vmem:[#allocation10 + $0x3b8] sm:$0xff] }
 0x277   :  { %v1015_v3 = vld [vmem:[#allocation10 + $0x7b8] sm:$0xff] }
 0x278   :  { %2535 = vmatpush2.bf16.msra.mxu1 %v3836_v24  ;;  %v3910_v24 = vcombine.low %v931_v11, %v935_v12 }
 0x279   :  { %2576 = vmatpush2.bf16.msra.mxu0 %v3964_v25  ;;  %2536 = vmatprep.subr.bf16.mxu1 %v3829_v26  ;;  %v3775_v25 = vcombine.high %v795_v16, %v799_v17  ;;  %v3903_v26 = vcombine.high %v923_v22, %v927_v23  ;;  %v871_v16 = vld [vmem:[#allocation10 + $0x338] sm:$0xff] }
 0x27a   :  { %2577 = vmatprep.subr.bf16.mxu0 %v3957_v29  ;;  %v787_v29 = vld [vmem:[#allocation10 + $0x98] sm:$0xff] }
 0x27b   :  { %v3766_v42 = vcombine.low %v787_v29, %v791_v31  ;;  %v995_v17 = vld [vmem:[#allocation10 + $0x718] sm:$0xff] }
 0x27c   :  { %2537 = vmatpush2.bf16.msra.mxu1 %v3828_v35  ;;  %v3902_v35 = vcombine.low %v923_v22, %v927_v23  ;;  %v999_v22 = vld [vmem:[#allocation10 + $0x738] sm:$0xff] }
 0x27d   :  { %2578 = vmatpush2.bf16.msra.mxu0 %v3956_v36  ;;  %2538 = vmatprep.subr.bf16.mxu1 %v3821_v37  ;;  %v3767_v36 = vcombine.high %v787_v29, %v791_v31  ;;  %v3895_v37 = vcombine.high %v915_v32, %v919_v33  ;;  %v863_v29 = vld [vmem:[#allocation10 + $0x2f8] sm:$0xff] }
 0x27e   :  { %2579 = vmatprep.subr.bf16.mxu0 %v3949_v38  ;;  %v779_v38 = vld [vmem:[#allocation10 + $0x58] sm:$0xff] }
 0x27f   :  { %v3758_v50 = vcombine.low %v779_v38, %v783_v39  ;;  %v987_v31 = vld [vmem:[#allocation10 + $0x6d8] sm:$0xff] }
 0x280   :  { %2539 = vmatpush2.bf16.msra.mxu1 %v3820_v43  ;;  %v3894_v43 = vcombine.low %v915_v32, %v919_v33  ;;  %v991_v32 = vld [vmem:[#allocation10 + $0x6f8] sm:$0xff] }
 0x281   :  { %2580 = vmatpush2.bf16.msra.mxu0 %v3948_v44  ;;  %2540 = vmatprep.subr.bf16.mxu1 %v3813_v45  ;;  %v3759_v44 = vcombine.high %v779_v38, %v783_v39  ;;  %v3887_v45 = vcombine.high %v907_v40, %v911_v41  ;;  %v855_v38 = vld [vmem:[#allocation10 + $0x2b8] sm:$0xff] }
 0x282   :  { %2581 = vmatprep.subr.bf16.mxu0 %v3941_v46  ;;  %v771_v46 = vld [vmem:[#allocation10 + $0x18] sm:$0xff] }
 0x283   :  { %v3750_v60 = vcombine.low %v771_v46, %v775_v47  ;;  %v979_v39 = vld [vmem:[#allocation10 + $0x698] sm:$0xff] }
 0x284   :  { %2541 = vmatpush2.bf16.msra.mxu1 %v3812_v52  ;;  %v3886_v52 = vcombine.low %v907_v40, %v911_v41  ;;  %v983_v40 = vld [vmem:[#allocation10 + $0x6b8] sm:$0xff] }
 0x285   :  { %2582 = vmatpush2.bf16.msra.mxu0 %v3940_v54  ;;  %2592 = vmatprep.subr.bf16.mxu1 %v3807_v55  ;;  %v3751_v54 = vcombine.high %v771_v46, %v775_v47  ;;  %v3879_v55 = vcombine.high %v899_v48, %v903_v49  ;;  %v847_v46 = vld [vmem:[#allocation10 + $0x278] sm:$0xff] }
 0x286   :  { %2633 = vmatprep.subr.bf16.mxu0 %v3935_v56  ;;  %v891_v56 = vld [vmem:[#allocation10 + $0x3d8] sm:$0xff] }
 0x287   :  { %2543 = vmatmul.mubr.bf16.vlgmr.msra.gmra.mxu1 %v4721_v20  ;;  %v3870_v4 = vcombine.low %v891_v56, %v895_v57  ;;  %v971_v47 = vld [vmem:[#allocation10 + $0x658] sm:$0xff] }
 0x288   :  { %2584 = vmatmul.mubr.bf16.vlgmr.msra.gmra.mxu0 %v4723_v21  ;;  %2593 = vmatpush1.bf16.msra.mxu1 %v3806_v59  ;;  %v1023_v59 = vld [vmem:[#allocation10 + $0x7f8] sm:$0xff] }
 0x289   :  { %2624 = vmatprep.mubr.bf16.mxu1 %v4717_v18  ;;  %2634 = vmatpush1.bf16.msra.mxu0 %v3934_v62  ;;  %v3911_v18 = vcombine.high %v931_v11, %v935_v12  ;;  %v3871_v62 = vcombine.high %v891_v56, %v895_v57  ;;  %v1007_v11 = vld [vmem:[#allocation10 + $0x778] sm:$0xff]  ;;  %v3862_v12 = vcombine.low %v883_v0, %v887_v1 }
 0x28a   :  { %2665 = vmatprep.mubr.bf16.mxu0 %v4719_v19  ;;  %2594 = vmatprep.subr.bf16.mxu1 %v3799_v63  ;;  %v3782_v19 = vcombine.low %v803_v9, %v807_v10  ;;  %v3999_v63 = vcombine.high %v1019_v58, %v1023_v59  ;;  %v879_v9 = vld [vmem:[#allocation10 + $0x378] sm:$0xff] }
 0x28b   :  { %2635 = vmatprep.subr.bf16.mxu0 %v3927_v2  ;;  %v1011_v2 = vld [vmem:[#allocation10 + $0x798] sm:$0xff] }
 0x28c   :  { %2595 = vmatpush1.bf16.msra.mxu1 %v3798_v5  ;;  %v3998_v5 = vcombine.low %v1019_v58, %v1023_v59  ;;  %v1003_v10 = vld [vmem:[#allocation10 + $0x758] sm:$0xff] }
 0x28d   :  { %2636 = vmatpush1.bf16.msra.mxu0 %v3926_v6  ;;  %2596 = vmatprep.subr.bf16.mxu1 %v3791_v7  ;;  %v3863_v6 = vcombine.high %v883_v0, %v887_v1  ;;  %v3991_v7 = vcombine.high %v1011_v2, %v1015_v3  ;;  %v975_v48 = vld [vmem:[#allocation10 + $0x678] sm:$0xff] }
 0x28e   :  { %2637 = vmatprep.subr.bf16.mxu0 %v3919_v8  ;;  %v875_v8 = vld [vmem:[#allocation10 + $0x358] sm:$0xff] }
 0x28f   :  { %v3854_v23 = vcombine.low %v875_v8, %v879_v9  ;;  %v839_v56 = vld [vmem:[#allocation10 + $0x238] sm:$0xff] }
 0x290   :  { %2597 = vmatpush1.bf16.msra.mxu1 %v3790_v13  ;;  %v3990_v13 = vcombine.low %v1011_v2, %v1015_v3  ;;  %v963_v57 = vld [vmem:[#allocation10 + $0x618] sm:$0xff] }
 0x291   :  { %2638 = vmatpush1.bf16.msra.mxu0 %v3918_v14  ;;  %2598 = vmatprep.subr.bf16.mxu1 %v3783_v15  ;;  %v3855_v14 = vcombine.high %v875_v8, %v879_v9  ;;  %v3983_v15 = vcombine.high %v1003_v10, %v1007_v11  ;;  %v967_v58 = vld [vmem:[#allocation10 + $0x638] sm:$0xff]  ;;  %v4282_v8 = vld [vmem:[#allocation11 + $0x164] ss:$8 sps:$4 sm:$0xff]  }
 0x292   :  { %2639 = vmatprep.subr.bf16.mxu0 %v3911_v18  ;;  %v867_v18 = vld [vmem:[#allocation10 + $0x318] sm:$0xff]  ;;  %v3942_v0 = vcombine.low %v963_v57, %v967_v58 }
 0x293   :  { %v3846_v33 = vcombine.low %v867_v18, %v871_v16  ;;  %v4264_v1 = vld [vmem:[#allocation11 + $0x74] ss:$8 sps:$4 sm:$0xff]   ;;  %v4262_v3 = vld [vmem:[#allocation11 + $0x70] ss:$8 sps:$4 sm:$0xff]  }
 0x294   :  { %2599 = vmatpush1.bf16.msra.mxu1 %v3782_v19  ;;  %v3982_v19 = vcombine.low %v1003_v10, %v1007_v11  ;;  %v4276_v2 = vld [vmem:[#allocation11 + $0x174] ss:$8 sps:$4 sm:$0xff]   ;;  %v4265_v11 = vld [vmem:[#allocation11 + $0x60] ss:$8 sps:$4 sm:$0xff]  }
 0x295   :  { %2640 = vmatpush1.bf16.msra.mxu0 %v3910_v24  ;;  %2600 = vmatprep.subr.bf16.mxu1 %v3775_v25  ;;  %v3847_v24 = vcombine.high %v867_v18, %v871_v16  ;;  %v3975_v25 = vcombine.high %v995_v17, %v999_v22  ;;  %v4288_v16 = vld [vmem:[#allocation11 + $0x154] ss:$8 sps:$4 sm:$0xff]  }
 0x296   :  { %2641 = vmatprep.subr.bf16.mxu0 %v3903_v26  ;;  %v859_v26 = vld [vmem:[#allocation10 + $0x2d8] sm:$0xff] }
 0x297   :  { %v3838_v41 = vcombine.low %v859_v26, %v863_v29 }
 0x298   :  { %2601 = vmatpush1.bf16.msra.mxu1 %v3774_v34  ;;  %v3974_v34 = vcombine.low %v995_v17, %v999_v22 }
 0x299   :  { %2642 = vmatpush1.bf16.msra.mxu0 %v3902_v35  ;;  %2602 = vmatprep.subr.bf16.mxu1 %v3767_v36  ;;  %v3839_v35 = vcombine.high %v859_v26, %v863_v29  ;;  %v3967_v36 = vcombine.high %v987_v31, %v991_v32  ;;  %v4294_v29 = vld [vmem:[#allocation11 + $0x144] ss:$8 sps:$4 sm:$0xff]  }
 0x29a   :  { %2643 = vmatprep.subr.bf16.mxu0 %v3895_v37  ;;  %v851_v37 = vld [vmem:[#allocation10 + $0x298] sm:$0xff] }
 0x29b   :  { %v3830_v49 = vcombine.low %v851_v37, %v855_v38 }
 0x29c   :  { %2603 = vmatpush1.bf16.msra.mxu1 %v3766_v42  ;;  %v3966_v42 = vcombine.low %v987_v31, %v991_v32  ;;  %v4271_v32 = vld [vmem:[#allocation11 + $0x40] ss:$8 sps:$4 sm:$0xff]  }
 0x29d   :  { %2644 = vmatpush1.bf16.msra.mxu0 %v3894_v43  ;;  %2604 = vmatprep.subr.bf16.mxu1 %v3759_v44  ;;  %v3831_v43 = vcombine.high %v851_v37, %v855_v38  ;;  %v3959_v44 = vcombine.high %v979_v39, %v983_v40  ;;  %v4277_v37 = vld [vmem:[#allocation11 + $0x30] ss:$8 sps:$4 sm:$0xff]   ;;  %v4285_v38 = vld [vmem:[#allocation11 + $0x24] ss:$8 sps:$4 sm:$0xff]  }
 0x29e   :  { %2645 = vmatprep.subr.bf16.mxu0 %v3887_v45  ;;  %v843_v45 = vld [vmem:[#allocation10 + $0x258] sm:$0xff] }
 0x29f   :  { %v3822_v59 = vcombine.low %v843_v45, %v847_v46 }
 0x2a0   :  { %2605 = vmatpush1.bf16.msra.mxu1 %v3758_v50  ;;  %v3958_v50 = vcombine.low %v979_v39, %v983_v40  ;;  %v4298_v39 = vld [vmem:[#allocation11 + $0x130] ss:$8 sps:$4 sm:$0xff]   ;;  %v4306_v40 = vld [vmem:[#allocation11 + $0x124] ss:$8 sps:$4 sm:$0xff]  }
 0x2a1   :  { %2646 = vmatpush1.bf16.msra.mxu0 %v3886_v52  ;;  %2606 = vmatprep.subr.bf16.mxu1 %v3751_v54  ;;  %v3823_v52 = vcombine.high %v843_v45, %v847_v46  ;;  %v3951_v54 = vcombine.high %v971_v47, %v975_v48  ;;  %v4289_v45 = vld [vmem:[#allocation11 + $0x10] ss:$8 sps:$4 sm:$0xff]   ;;  %v4297_v46 = vld [vmem:[#allocation11 + $0x4] ss:$8 sps:$4 sm:$0xff]  }
 0x2a2   :  { %2647 = vmatprep.subr.bf16.mxu0 %v3879_v55  ;;  %v835_v55 = vld [vmem:[#allocation10 + $0x218] sm:$0xff] }
 0x2a4   :  { %2607 = vmatpush1.bf16.msra.mxu1 %v3750_v60  ;;  %v3950_v60 = vcombine.low %v971_v47, %v975_v48  ;;  %v4310_v47 = vld [vmem:[#allocation11 + $0x110] ss:$8 sps:$4 sm:$0xff]   ;;  %v4318_v48 = vld [vmem:[#allocation11 + $0x104] ss:$8 sps:$4 sm:$0xff]  }
 0x2a5   :  { %2648 = vmatpush1.bf16.msra.mxu0 %v3878_v61  ;;  %2608 = vmatprep.subr.bf16.mxu1 %v3871_v62  ;;  %v3815_v61 = vcombine.high %v835_v55, %v839_v56  ;;  %v3943_v62 = vcombine.high %v963_v57, %v967_v58  ;;  %v4322_v57 = vld [vmem:[#allocation11 + $0x1f0] ss:$8 sps:$4 sm:$0xff]   ;;  %v4330_v58 = vld [vmem:[#allocation11 + $0x1e4] ss:$8 sps:$4 sm:$0xff]  }
 0x2a6   :  { %2649 = vmatprep.subr.bf16.mxu0 %v3999_v63  ;;  %v3814_v63 = vcombine.low %v835_v55, %v839_v56  ;;  %v4301_v55 = vld [vmem:[#allocation11 + $0xf0] ss:$8 sps:$4 sm:$0xff]   ;;  %v4309_v56 = vld [vmem:[#allocation11 + $0xe4] ss:$8 sps:$4 sm:$0xff]  }
 0x2a8   :  { %2609 = vmatpush2.bf16.msra.mxu1 %v3870_v4  ;;  %v4742_v4 = vld [vmem:[%s4784_s6] sm:$0xff] }
 0x2a9   :  { %2650 = vmatpush2.bf16.msra.mxu0 %v3998_v5  ;;  %2610 = vmatprep.subr.bf16.mxu1 %v3863_v6  ;;  %v4267_v5 = vld [vmem:[#allocation11 + $0x64] ss:$8 sps:$4 sm:$0xff]   ;;  %v4274_v6 = vld [vmem:[#allocation11 + $0x170] ss:$8 sps:$4 sm:$0xff]  }
 0x2aa   :  { %2651 = vmatprep.subr.bf16.mxu0 %v3991_v7  ;;  %v1033_v7 = vrot.slane %v4742_v4, %v4705_v30 }
 0x2ac   :  { %2611 = vmatpush2.bf16.msra.mxu1 %v3862_v12 }
 0x2ad   :  { %2652 = vmatpush2.bf16.msra.mxu0 %v3990_v13  ;;  %2612 = vmatprep.subr.bf16.mxu1 %v3855_v14  ;;  %v4270_v14 = vld [vmem:[#allocation11 + $0x54] ss:$8 sps:$4 sm:$0xff]  }
 0x2ae   :  { %2653 = vmatprep.subr.bf16.mxu0 %v3983_v15  ;;  %v4280_v15 = vld [vmem:[#allocation11 + $0x160] ss:$8 sps:$4 sm:$0xff]  }
 0x2b0   :  { %2613 = vmatpush2.bf16.msra.mxu1 %v3854_v23  ;;  %v4268_v23 = vld [vmem:[#allocation11 + $0x50] ss:$8 sps:$4 sm:$0xff]  }
 0x2b1   :  { %2654 = vmatpush2.bf16.msra.mxu0 %v3982_v19  ;;  %2614 = vmatprep.subr.bf16.mxu1 %v3847_v24 }
 0x2b2   :  { %2655 = vmatprep.subr.bf16.mxu0 %v3975_v25  ;;  %v4286_v25 = vld [vmem:[#allocation11 + $0x150] ss:$8 sps:$4 sm:$0xff]  }
 0x2b4   :  { %2615 = vmatpush2.bf16.msra.mxu1 %v3846_v33  ;;  %v4279_v33 = vld [vmem:[#allocation11 + $0x34] ss:$8 sps:$4 sm:$0xff]  }
 0x2b5   :  { %2656 = vmatpush2.bf16.msra.mxu0 %v3974_v34  ;;  %2616 = vmatprep.subr.bf16.mxu1 %v3839_v35  ;;  %v4292_v34 = vld [vmem:[#allocation11 + $0x140] ss:$8 sps:$4 sm:$0xff]  }
 0x2b6   :  { %2657 = vmatprep.subr.bf16.mxu0 %v3967_v36  ;;  %v4300_v36 = vld [vmem:[#allocation11 + $0x134] ss:$8 sps:$4 sm:$0xff]  }
 0x2b8   :  { %2617 = vmatpush2.bf16.msra.mxu1 %v3838_v41  ;;  %v4283_v41 = vld [vmem:[#allocation11 + $0x20] ss:$8 sps:$4 sm:$0xff]  }
 0x2b9   :  { %2658 = vmatpush2.bf16.msra.mxu0 %v3966_v42  ;;  %2618 = vmatprep.subr.bf16.mxu1 %v3831_v43  ;;  %v4291_v42 = vld [vmem:[#allocation11 + $0x14] ss:$8 sps:$4 sm:$0xff]   ;;  %v4304_v43 = vld [vmem:[#allocation11 + $0x120] ss:$8 sps:$4 sm:$0xff]  }
 0x2ba   :  { %2659 = vmatprep.subr.bf16.mxu0 %v3959_v44  ;;  %v4312_v44 = vld [vmem:[#allocation11 + $0x114] ss:$8 sps:$4 sm:$0xff]  }
 0x2bc   :  { %2619 = vmatpush2.bf16.msra.mxu1 %v3830_v49  ;;  %v4295_v49 = vld [vmem:[#allocation11] ss:$8 sps:$4 sm:$0xff]  }
 0x2bd   :  { %2660 = vmatpush2.bf16.msra.mxu0 %v3958_v50  ;;  %2620 = vmatprep.subr.bf16.mxu1 %v3823_v52  ;;  %v4303_v50 = vld [vmem:[#allocation11 + $0xf4] ss:$8 sps:$4 sm:$0xff]   ;;  %v4316_v52 = vld [vmem:[#allocation11 + $0x100] ss:$8 sps:$4 sm:$0xff]  }
 0x2be   :  { %2661 = vmatprep.subr.bf16.mxu0 %v3951_v54  ;;  %v4324_v54 = vld [vmem:[#allocation11 + $0x1f4] ss:$8 sps:$4 sm:$0xff]  }
 0x2c0   :  { %2621 = vmatpush2.bf16.msra.mxu1 %v3822_v59  ;;  %v4307_v59 = vld [vmem:[#allocation11 + $0xe0] ss:$8 sps:$4 sm:$0xff]  }
 0x2c1   :  { %2662 = vmatpush2.bf16.msra.mxu0 %v3950_v60  ;;  %2622 = vmatprep.subr.bf16.mxu1 %v3815_v61  ;;  %v4315_v60 = vld [vmem:[#allocation11 + $0xd4] ss:$8 sps:$4 sm:$0xff]   ;;  %v4328_v61 = vld [vmem:[#allocation11 + $0x1e0] ss:$8 sps:$4 sm:$0xff]  }
 0x2c2   :  { %2663 = vmatprep.subr.bf16.mxu0 %v3943_v62  ;;  %v4336_v62 = vld [vmem:[#allocation11 + $0x1d4] ss:$8 sps:$4 sm:$0xff]  }
 0x2c4   :  { %2623 = vmatpush2.bf16.msra.mxu1 %v3814_v63  ;;  %v4313_v63 = vld [vmem:[#allocation11 + $0xd0] ss:$8 sps:$4 sm:$0xff]  }
 0x2c5   :  { %2664 = vmatpush2.bf16.msra.mxu0 %v3942_v0  ;;  %3478 = vmatprep.subr.bf16.mxu1 %v4264_v1  ;;  %v4321_v0 = vld [vmem:[#allocation11 + $0xc4] ss:$8 sps:$4 sm:$0xff]   ;;  %v4334_v1 = vld [vmem:[#allocation11 + $0x1d0] ss:$8 sps:$4 sm:$0xff]  }
 0x2c6   :  { %3519 = vmatprep.subr.bf16.mxu0 %v4276_v2  ;;  %v4342_v2 = vld [vmem:[#allocation11 + $0x1c4] ss:$8 sps:$4 sm:$0xff]  }
 0x2c7   :  { %2625 = vmatmul.mubr.bf16.vlgmr.msra.gmra.mxu1 %v4721_v20  ;;  %v4747_v9 = vpop.f32.mrf.mxu1  ;;  %v4749_v10 = vpop.f32.mrf.mxu0 }
 0x2c8   :  { %2666 = vmatmul.mubr.bf16.vlgmr.msra.gmra.mxu0 %v4723_v21  ;;  %3479 = vmatpush1.bf16.msra.mxu1 %v4262_v3  ;;  %v4273_v21 = vld [vmem:[#allocation11 + $0x44] ss:$8 sps:$4 sm:$0xff]   ;;  %v4319_v3 = vld [vmem:[#allocation11 + $0xc0] ss:$8 sps:$4 sm:$0xff]  }
 0x2c9   :  { %v2382_v12 = vpop.f32.mrf.mxu1  ;;  %v2423_v13 = vpop.f32.mrf.mxu0  ;;  %3480 = vmatprep.subr.bf16.mxu1 %v4267_v5  ;;  %3520 = vmatpush1.bf16.msra.mxu0 %v4274_v6  ;;  %v1029_v5 = vrot.slane %v4742_v4, %v4699_v28  ;;  %v4327_v6 = vld [vmem:[#allocation11 + $0xb4] ss:$8 sps:$4 sm:$0xff]  }
 0x2ca   :  { %v2383_v18 = vadd.f32 %v2382_v12, %v1033_v7  ;;  %3521 = vmatprep.subr.bf16.mxu0 %v4282_v8  ;;  %v4340_v7 = vld [vmem:[#allocation11 + $0x1c0] ss:$8 sps:$4 sm:$0xff]   ;;  %v4348_v8 = vld [vmem:[#allocation11 + $0x1b4] ss:$8 sps:$4 sm:$0xff]  }
 0x2cb   :  { %v2384_v17 = vpop.f32.mrf.mxu1  ;;  %v2425_v22 = vpop.f32.mrf.mxu0  ;;  %v2381_v12 = vadd.f32 %v4747_v9, %v1029_v5  ;;  %v4345_v9 = vld [vmem:[#allocation11 + $0x84] ss:$8 sps:$4 sm:$0xff]   ;;  %v4378_v5 = vld [vmem:[#allocation11 + $0x214] ss:$8 sps:$4 sm:$0xff]  }
 0x2cc   :  { %v2424_v20 = vadd.f32 %v2423_v13, %v2383_v18  ;;  %3481 = vmatpush1.bf16.msra.mxu1 %v4265_v11  ;;  %v4325_v11 = vld [vmem:[#allocation11 + $0xb0] ss:$8 sps:$4 sm:$0xff]   ;;  %v4333_v13 = vld [vmem:[#allocation11 + $0xa4] ss:$8 sps:$4 sm:$0xff]   ;;  %v4331_v18 = vld [vmem:[#allocation11 + $0xa0] ss:$8 sps:$4 sm:$0xff]  }
 0x2cd   :  { %v2385_v19 = vpop.f32.mrf.mxu1  ;;  %v2426_v24 = vpop.f32.mrf.mxu0  ;;  %3482 = vmatprep.subr.bf16.mxu1 %v4270_v14  ;;  %3522 = vmatpush1.bf16.msra.mxu0 %v4280_v15  ;;  %v4346_v14 = vld [vmem:[#allocation11 + $0x1b0] ss:$8 sps:$4 sm:$0xff]   ;;  %v4351_v15 = vld [vmem:[#allocation11 + $0x1a4] ss:$8 sps:$4 sm:$0xff]   ;;  %v4339_v17 = vld [vmem:[#allocation11 + $0x94] ss:$8 sps:$4 sm:$0xff]  }
 0x2ce   :  { %v2675_v26 = vmul.f32 0.2, %v2424_v20  ;;  %3523 = vmatprep.subr.bf16.mxu0 %v4288_v16  ;;  %v2422_v16 = vadd.f32 %v4749_v10, %v2381_v12  ;;  %v4349_v22 = vld [vmem:[#allocation11 + $0x1a0] ss:$8 sps:$4 sm:$0xff]   ;;  %v4352_v24 = vld [vmem:[#allocation11 + $0x190] ss:$8 sps:$4 sm:$0xff]  }
 0x2cf   :  { %v4355_v10 = vld [vmem:[#allocation11 + $0x180] ss:$8 sps:$4 sm:$0xff]  }
 0x2d0   :  { %v2683_v31 = vmax.f32 %v2424_v20, %v2675_v26  ;;  %3483 = vmatpush1.bf16.msra.mxu1 %v4268_v23  ;;  %v4354_v20 = vld [vmem:[#allocation11 + $0x194] ss:$8 sps:$4 sm:$0xff]   ;;  %v4337_v23 = vld [vmem:[#allocation11 + $0x90] ss:$8 sps:$4 sm:$0xff]   ;;  %v2674_v19 = vmul.f32 0.2, %v2422_v16 }
 0x2d1   :  { %3484 = vmatprep.subr.bf16.mxu1 %v4273_v21  ;;  %3524 = vmatpush1.bf16.msra.mxu0 %v4286_v25  ;;  %v4357_v21 = vld [vmem:[#allocation11 + $0x184] ss:$8 sps:$4 sm:$0xff]   ;;  %v4343_v25 = vld [vmem:[#allocation11 + $0x80] ss:$8 sps:$4 sm:$0xff]  }
 0x2d2   :  { %v2691_v35 = vpack.c.bf16 %v2683_v31, %v2683_v31  ;;  %3525 = vmatprep.subr.bf16.mxu0 %v4294_v29  ;;  %v2682_v26 = vmax.f32 %v2422_v16, %v2674_v19  ;;  %v4360_v29 = vld [vmem:[#allocation11 + $0x274] ss:$8 sps:$4 sm:$0xff]   ;;  %v4415_v12 = vld [vmem:[#allocation11 + $0x340] ss:$8 sps:$4 sm:$0xff]   ;;  %v4423_v16 = vld [vmem:[#allocation11 + $0x324] ss:$8 sps:$4 sm:$0xff]  }
 0x2d3   :  { %v4408_v31 = vld [vmem:[#allocation11 + $0x374] ss:$8 sps:$4 sm:$0xff]   ;;  %v4385_v19 = vld [vmem:[#allocation11 + $0x2e0] ss:$8 sps:$4 sm:$0xff]  }
 0x2d4   :  { %3485 = vmatpush1.bf16.msra.mxu1 %v4271_v32  ;;  %3510 = vmatprep.mubr.bf16.mxu1 %v2691_v35  ;;  %v1037_v32 = vrot.slane %v4742_v4, %v344_v51  ;;  %v4363_v35 = vld [vmem:[#allocation11 + $0x264] ss:$8 sps:$4 sm:$0xff]   ;;  %v4366_v51 = vld [vmem:[#allocation11 + $0x254] ss:$8 sps:$4 sm:$0xff]  }
 0x2d5   :  { %3486 = vmatprep.subr.bf16.mxu1 %v4279_v33  ;;  %3526 = vmatpush1.bf16.msra.mxu0 %v4292_v34  ;;  %v4358_v33 = vld [vmem:[#allocation11 + $0x270] ss:$8 sps:$4 sm:$0xff]   ;;  %v2690_v34 = vpack.c.bf16 %v2682_v26, %v2682_v26  ;;  %v4393_v26 = vld [vmem:[#allocation11 + $0x2c4] ss:$8 sps:$4 sm:$0xff]  }
 0x2d6   :  { %3527 = vmatprep.subr.bf16.mxu0 %v4300_v36  ;;  %v1041_v36 = vrot.slane %v4742_v4, %v348_v53 }
 0x2d8   :  { %3487 = vmatpush1.bf16.msra.mxu1 %v4277_v37 }
 0x2d9   :  { %3488 = vmatprep.subr.bf16.mxu1 %v4285_v38  ;;  %3528 = vmatpush1.bf16.msra.mxu0 %v4298_v39 }
 0x2da   :  { %3529 = vmatprep.subr.bf16.mxu0 %v4306_v40  ;;  %v4361_v40 = vld [vmem:[#allocation11 + $0x260] ss:$8 sps:$4 sm:$0xff]  }
 0x2dc   :  { %3489 = vmatpush1.bf16.msra.mxu1 %v4283_v41 }
 0x2dd   :  { %3490 = vmatprep.subr.bf16.mxu1 %v4291_v42  ;;  %3530 = vmatpush1.bf16.msra.mxu0 %v4304_v43 }
 0x2de   :  { %3531 = vmatprep.subr.bf16.mxu0 %v4312_v44 }
 0x2e0   :  { %3491 = vmatpush1.bf16.msra.mxu1 %v4289_v45 }
 0x2e1   :  { %3492 = vmatprep.subr.bf16.mxu1 %v4297_v46  ;;  %3532 = vmatpush1.bf16.msra.mxu0 %v4310_v47 }
 0x2e2   :  { %3533 = vmatprep.subr.bf16.mxu0 %v4318_v48 }
 0x2e4   :  { %3493 = vmatpush1.bf16.msra.mxu1 %v4295_v49  ;;  %v4364_v49 = vld [vmem:[#allocation11 + $0x250] ss:$8 sps:$4 sm:$0xff]  }
 0x2e5   :  { %3494 = vmatprep.subr.bf16.mxu1 %v4303_v50  ;;  %3534 = vmatpush1.bf16.msra.mxu0 %v4316_v52  ;;  %v4369_v52 = vld [vmem:[#allocation11 + $0x244] ss:$8 sps:$4 sm:$0xff]  }
 0x2e6   :  { %3535 = vmatprep.subr.bf16.mxu0 %v4324_v54 }
 0x2e8   :  { %3495 = vmatpush2.bf16.msra.mxu1 %v4301_v55 }
 0x2e9   :  { %3496 = vmatprep.subr.bf16.mxu1 %v4309_v56  ;;  %3536 = vmatpush2.bf16.msra.mxu0 %v4322_v57  ;;  %v4367_v57 = vld [vmem:[#allocation11 + $0x240] ss:$8 sps:$4 sm:$0xff]  }
 0x2ea   :  { %3537 = vmatprep.subr.bf16.mxu0 %v4330_v58  ;;  %v4372_v58 = vld [vmem:[#allocation11 + $0x234] ss:$8 sps:$4 sm:$0xff]  }
 0x2ec   :  { %3497 = vmatpush2.bf16.msra.mxu1 %v4307_v59 }
 0x2ed   :  { %3498 = vmatprep.subr.bf16.mxu1 %v4315_v60  ;;  %3538 = vmatpush2.bf16.msra.mxu0 %v4328_v61  ;;  %v4406_v60 = vld [vmem:[#allocation11 + $0x370] ss:$8 sps:$4 sm:$0xff]  }
 0x2ee   :  { %3539 = vmatprep.subr.bf16.mxu0 %v4336_v62  ;;  %v4411_v62 = vld [vmem:[#allocation11 + $0x364] ss:$8 sps:$4 sm:$0xff]  }
 0x2f0   :  { %3499 = vmatpush2.bf16.msra.mxu1 %v4313_v63  ;;  %v4370_v63 = vld [vmem:[#allocation11 + $0x230] ss:$8 sps:$4 sm:$0xff]  }
 0x2f1   :  { %3500 = vmatprep.subr.bf16.mxu1 %v4321_v0  ;;  %3540 = vmatpush2.bf16.msra.mxu0 %v4334_v1  ;;  %v4375_v0 = vld [vmem:[#allocation11 + $0x224] ss:$8 sps:$4 sm:$0xff]   ;;  %v4409_v1 = vld [vmem:[#allocation11 + $0x360] ss:$8 sps:$4 sm:$0xff]  }
 0x2f2   :  { %3541 = vmatprep.subr.bf16.mxu0 %v4342_v2  ;;  %v4414_v2 = vld [vmem:[#allocation11 + $0x354] ss:$8 sps:$4 sm:$0xff]  }
 0x2f4   :  { %3501 = vmatpush2.bf16.msra.mxu1 %v4319_v3  ;;  %v4373_v3 = vld [vmem:[#allocation11 + $0x220] ss:$8 sps:$4 sm:$0xff]  }
 0x2f5   :  { %3502 = vmatprep.subr.bf16.mxu1 %v4327_v6  ;;  %3542 = vmatpush2.bf16.msra.mxu0 %v4340_v7  ;;  %v4412_v6 = vld [vmem:[#allocation11 + $0x350] ss:$8 sps:$4 sm:$0xff]   ;;  %v4417_v7 = vld [vmem:[#allocation11 + $0x344] ss:$8 sps:$4 sm:$0xff]  }
 0x2f6   :  { %3543 = vmatprep.subr.bf16.mxu0 %v4348_v8  ;;  %v4376_v8 = vld [vmem:[#allocation11 + $0x210] ss:$8 sps:$4 sm:$0xff]  }
 0x2f8   :  { %3503 = vmatpush2.bf16.msra.mxu1 %v4325_v11  ;;  %v4381_v11 = vld [vmem:[#allocation11 + $0x204] ss:$8 sps:$4 sm:$0xff]  }
 0x2f9   :  { %3504 = vmatprep.subr.bf16.mxu1 %v4333_v13  ;;  %3544 = vmatpush2.bf16.msra.mxu0 %v4346_v14  ;;  %v4420_v13 = vld [vmem:[#allocation11 + $0x334] ss:$8 sps:$4 sm:$0xff]   ;;  %v4379_v14 = vld [vmem:[#allocation11 + $0x200] ss:$8 sps:$4 sm:$0xff]  }
 0x2fa   :  { %3545 = vmatprep.subr.bf16.mxu0 %v4351_v15  ;;  %v4384_v15 = vld [vmem:[#allocation11 + $0x2f4] ss:$8 sps:$4 sm:$0xff]  }
 0x2fc   :  { %3505 = vmatpush2.bf16.msra.mxu1 %v4331_v18  ;;  %v4418_v18 = vld [vmem:[#allocation11 + $0x330] ss:$8 sps:$4 sm:$0xff]  }
 0x2fd   :  { %3506 = vmatprep.subr.bf16.mxu1 %v4339_v17  ;;  %3546 = vmatpush2.bf16.msra.mxu0 %v4349_v22  ;;  %v4382_v17 = vld [vmem:[#allocation11 + $0x2f0] ss:$8 sps:$4 sm:$0xff]   ;;  %v4387_v22 = vld [vmem:[#allocation11 + $0x2e4] ss:$8 sps:$4 sm:$0xff]  }
 0x2fe   :  { %3547 = vmatprep.subr.bf16.mxu0 %v4354_v20  ;;  %v4421_v20 = vld [vmem:[#allocation11 + $0x320] ss:$8 sps:$4 sm:$0xff]  }
 0x300   :  { %3507 = vmatpush2.bf16.msra.mxu1 %v4337_v23  ;;  %v4426_v23 = vld [vmem:[#allocation11 + $0x314] ss:$8 sps:$4 sm:$0xff]  }
 0x301   :  { %3508 = vmatprep.subr.bf16.mxu1 %v4345_v9  ;;  %3548 = vmatpush2.bf16.msra.mxu0 %v4352_v24  ;;  %v4390_v9 = vld [vmem:[#allocation11 + $0x2d4] ss:$8 sps:$4 sm:$0xff]   ;;  %v4424_v24 = vld [vmem:[#allocation11 + $0x310] ss:$8 sps:$4 sm:$0xff]  }
 0x302   :  { %3549 = vmatprep.subr.bf16.mxu0 %v4357_v21  ;;  %v4429_v21 = vld [vmem:[#allocation11 + $0x304] ss:$8 sps:$4 sm:$0xff]  }
 0x304   :  { %3509 = vmatpush2.bf16.msra.mxu1 %v4343_v25  ;;  %v4388_v25 = vld [vmem:[#allocation11 + $0x2d0] ss:$8 sps:$4 sm:$0xff]  }
 0x305   :  { %3550 = vmatpush2.bf16.msra.mxu0 %v4355_v10  ;;  %3560 = vmatprep.subr.bf16.mxu1 %v4360_v29  ;;  %v4427_v10 = vld [vmem:[#allocation11 + $0x300] ss:$8 sps:$4 sm:$0xff]   ;;  %v4432_v29 = vld [vmem:[#allocation11 + $0x3f4] ss:$8 sps:$4 sm:$0xff]  }
 0x306   :  { %3601 = vmatprep.subr.bf16.mxu0 %v4408_v31  ;;  %v4391_v31 = vld [vmem:[#allocation11 + $0x2c0] ss:$8 sps:$4 sm:$0xff]  }
 0x307   :  { %v2462_v37 = vpop.f32.mrf.mxu1  ;;  %v2503_v38 = vpop.f32.mrf.mxu0  ;;  %3511 = vmatmul.mubr.bf16.vlgmr.msra.gmra.mxu1 %v2690_v34  ;;  %v4435_v34 = vld [vmem:[#allocation11 + $0x3e4] ss:$8 sps:$4 sm:$0xff]  }
 0x308   :  { %v2463_v39 = vadd.f32 %v2462_v37, %v1037_v32  ;;  %3561 = vmatpush1.bf16.msra.mxu1 %v4358_v33  ;;  %v4396_v32 = vld [vmem:[#allocation11 + $0x2b4] ss:$8 sps:$4 sm:$0xff]   ;;  %v4430_v33 = vld [vmem:[#allocation11 + $0x3f0] ss:$8 sps:$4 sm:$0xff]   ;;  %v4433_v37 = vld [vmem:[#allocation11 + $0x3e0] ss:$8 sps:$4 sm:$0xff]  }
 0x309   :  { %v2464_v41 = vpop.f32.mrf.mxu1  ;;  %v2505_v42 = vpop.f32.mrf.mxu0  ;;  %3562 = vmatprep.subr.bf16.mxu1 %v4363_v35  ;;  %v4394_v35 = vld [vmem:[#allocation11 + $0x2b0] ss:$8 sps:$4 sm:$0xff]  }
 0x30a   :  { %v2504_v43 = vadd.f32 %v2503_v38, %v2463_v39  ;;  %v2465_v44 = vadd.f32 %v2464_v41, %v1041_v36  ;;  %v4399_v36 = vld [vmem:[#allocation11 + $0x2a4] ss:$8 sps:$4 sm:$0xff]   ;;  %v4438_v38 = vld [vmem:[#allocation11 + $0x3d4] ss:$8 sps:$4 sm:$0xff]   ;;  %v4397_v39 = vld [vmem:[#allocation11 + $0x2a0] ss:$8 sps:$4 sm:$0xff]  }
 0x30b   :  { %v2466_v45 = vpop.f32.mrf.mxu1  ;;  %v2507_v46 = vpop.f32.mrf.mxu0  ;;  %v4436_v41 = vld [vmem:[#allocation11 + $0x3d0] ss:$8 sps:$4 sm:$0xff]  }
 0x30c   :  { %v2676_v47 = vmul.f32 0.2, %v2504_v43  ;;  %v2506_v48 = vadd.f32 %v2505_v42, %v2465_v44  ;;  %3563 = vmatpush1.bf16.msra.mxu1 %v4361_v40  ;;  %v4402_v40 = vld [vmem:[#allocation11 + $0x294] ss:$8 sps:$4 sm:$0xff]   ;;  %v4441_v42 = vld [vmem:[#allocation11 + $0x3c4] ss:$8 sps:$4 sm:$0xff]  }
 0x30d   :  { %v2467_v53 = vpop.f32.mrf.mxu1  ;;  %v2508_v50 = vpop.f32.mrf.mxu0  ;;  %3564 = vmatprep.subr.bf16.mxu1 %v4366_v51  ;;  %v4400_v51 = vld [vmem:[#allocation11 + $0x290] ss:$8 sps:$4 sm:$0xff]   ;;  %v4439_v44 = vld [vmem:[#allocation11 + $0x3c0] ss:$8 sps:$4 sm:$0xff]   ;;  %v4444_v45 = vld [vmem:[#allocation11 + $0x3b4] ss:$8 sps:$4 sm:$0xff]  }
 0x30e   :  { %v2677_v54 = vmul.f32 0.2, %v2506_v48  ;;  %v2684_v55 = vmax.f32 %v2504_v43, %v2676_v47  ;;  %v4405_v43 = vld [vmem:[#allocation11 + $0x284] ss:$8 sps:$4 sm:$0xff]   ;;  %v1044_v46 = vsub.s32 4, %v4696_v27 }
 0x30f   :  { %v4403_v47 = vld [vmem:[#allocation11 + $0x280] ss:$8 sps:$4 sm:$0xff]   ;;  %v4447_v53 = vld [vmem:[#allocation11 + $0x3a4] ss:$8 sps:$4 sm:$0xff]  }
 0x310   :  { %v2685_v56 = vmax.f32 %v2506_v48, %v2677_v54  ;;  %3565 = vmatpush1.bf16.msra.mxu1 %v4364_v49  ;;  %v2692_v61 = vpack.c.bf16 %v2684_v55, %v2684_v55  ;;  %v1048_v48 = vsub.s32 5, %v4696_v27  ;;  %v4442_v49 = vld [vmem:[#allocation11 + $0x3b0] ss:$8 sps:$4 sm:$0xff]   ;;  %v1045_v50 = vrot.slane %v4742_v4, %v1044_v46  ;;  %v4445_v54 = vld [vmem:[#allocation11 + $0x3a0] ss:$8 sps:$4 sm:$0xff]  }
 0x311   :  { %3566 = vmatprep.subr.bf16.mxu1 %v4369_v52 }
 0x312   :  { %v2693_v59 = vpack.c.bf16 %v2685_v56, %v2685_v56  ;;  %v1049_v52 = vrot.slane %v4742_v4, %v1048_v48  ;;  %v4450_v56 = vld [vmem:[#allocation11 + $0x394] ss:$8 sps:$4 sm:$0xff]  }
 0x314   :  { %3551 = vmatprep.mubr.bf16.mxu0 %v2693_v59  ;;  %3567 = vmatpush1.bf16.msra.mxu1 %v4367_v57 }
 0x315   :  { %3552 = vmatmul.mubr.bf16.vlgmr.msra.gmra.mxu0 %v2692_v61  ;;  %3568 = vmatprep.subr.bf16.mxu1 %v4372_v58 }
 0x316   :  { %3602 = vmatpush1.bf16.msra.mxu0 %v4406_v60 }
 0x317   :  { %3603 = vmatprep.subr.bf16.mxu0 %v4411_v62 }
 0x318   :  { %3569 = vmatpush1.bf16.msra.mxu1 %v4370_v63  ;;  %v4448_v63 = vld [vmem:[#allocation11 + $0x390] ss:$8 sps:$4 sm:$0xff]  }
 0x319   :  { %3570 = vmatprep.subr.bf16.mxu1 %v4375_v0 }
 0x31a   :  { %3604 = vmatpush1.bf16.msra.mxu0 %v4409_v1  ;;  %v4453_v1 = vld [vmem:[#allocation11 + $0x384] ss:$8 sps:$4 sm:$0xff]  }
 0x31b   :  { %3605 = vmatprep.subr.bf16.mxu0 %v4414_v2 }
 0x31c   :  { %3571 = vmatpush1.bf16.msra.mxu1 %v4373_v3 }
 0x31d   :  { %3572 = vmatprep.subr.bf16.mxu1 %v4378_v5 }
 0x31e   :  { %3606 = vmatpush1.bf16.msra.mxu0 %v4412_v6 }
 0x31f   :  { %3607 = vmatprep.subr.bf16.mxu0 %v4417_v7 }
 0x320   :  { %3573 = vmatpush1.bf16.msra.mxu1 %v4376_v8 }
 0x321   :  { %3574 = vmatprep.subr.bf16.mxu1 %v4381_v11  ;;  %v4451_v11 = vld [vmem:[#allocation11 + $0x380] ss:$8 sps:$4 sm:$0xff]  }
 0x322   :  { %3608 = vmatpush1.bf16.msra.mxu0 %v4415_v12 }
 0x323   :  { %3609 = vmatprep.subr.bf16.mxu0 %v4420_v13 }
 0x324   :  { %3575 = vmatpush1.bf16.msra.mxu1 %v4379_v14 }
 0x325   :  { %3576 = vmatprep.subr.bf16.mxu1 %v4384_v15 }
 0x326   :  { %3610 = vmatpush1.bf16.msra.mxu0 %v4418_v18  ;;  %v1052_v18 = vsub.s32 6, %v4696_v27 }
 0x327   :  { %3611 = vmatprep.subr.bf16.mxu0 %v4423_v16  ;;  %v1056_v16 = vsub.s32 7, %v4696_v27 }
 0x328   :  { %3577 = vmatpush2.bf16.msra.mxu1 %v4382_v17  ;;  %v1053_v17 = vrot.slane %v4742_v4, %v1052_v18 }
 0x329   :  { %3578 = vmatprep.subr.bf16.mxu1 %v4387_v22  ;;  %v1057_v22 = vrot.slane %v4742_v4, %v1056_v16 }
 0x32a   :  { %3612 = vmatpush1.bf16.msra.mxu0 %v4421_v20 }
 0x32b   :  { %3613 = vmatprep.subr.bf16.mxu0 %v4426_v23 }
 0x32c   :  { %3579 = vmatpush2.bf16.msra.mxu1 %v4385_v19 }
 0x32d   :  { %3580 = vmatprep.subr.bf16.mxu1 %v4390_v9 }
 0x32e   :  { %3614 = vmatpush1.bf16.msra.mxu0 %v4424_v24 }
 0x32f   :  { %3615 = vmatprep.subr.bf16.mxu0 %v4429_v21 }
 0x330   :  { %3581 = vmatpush2.bf16.msra.mxu1 %v4388_v25 }
 0x331   :  { %3582 = vmatprep.subr.bf16.mxu1 %v4393_v26 }
 0x332   :  { %3616 = vmatpush1.bf16.msra.mxu0 %v4427_v10 }
 0x333   :  { %3617 = vmatprep.subr.bf16.mxu0 %v4432_v29 }
 0x334   :  { %3583 = vmatpush2.bf16.msra.mxu1 %v4391_v31 }
 0x335   :  { %3584 = vmatprep.subr.bf16.mxu1 %v4396_v32 }
 0x336   :  { %3618 = vmatpush2.bf16.msra.mxu0 %v4430_v33 }
 0x337   :  { %3619 = vmatprep.subr.bf16.mxu0 %v4435_v34 }
 0x338   :  { %3585 = vmatpush2.bf16.msra.mxu1 %v4394_v35 }
 0x339   :  { %3586 = vmatprep.subr.bf16.mxu1 %v4399_v36 }
 0x33a   :  { %3620 = vmatpush2.bf16.msra.mxu0 %v4433_v37 }
 0x33b   :  { %3621 = vmatprep.subr.bf16.mxu0 %v4438_v38 }
 0x33c   :  { %3587 = vmatpush2.bf16.msra.mxu1 %v4397_v39 }
 0x33d   :  { %3588 = vmatprep.subr.bf16.mxu1 %v4402_v40  ;;  %v2826_v40 = vld [vmem:[%s4786_s8] sm:$0x3]  ;;  %s4621_s8 = smov [#allocation13]  }
 0x33e   :  { %3622 = vmatpush2.bf16.msra.mxu0 %v4436_v41  ;;  %s3652_s22 = sshll.u32 %s4621_s8, 4  ;;  %s3653_s22 = int_to_ptr.vmem [resolvable:$true] %s3652_s22 }
 0x33f   :  { %3623 = vmatprep.subr.bf16.mxu0 %v4441_v42  ;;  %v2831_v42 = vrot.slane %v2826_v40, %v4699_v28  ;;  %s4578_s23 = scalar_lea.vmem %s3653_s22, 256  ;;  %p4583_p3 = scmp.lt.s32.totalorder %s3653_s22, %s3653_s22 }
 0x340   :  { %3589 = vmatpush2.bf16.msra.mxu1 %v4400_v51  ;;  %v2835_v51 = vrot.slane %v2826_v40, %v4705_v30  ;;  %p4579_p2 = scmp.ne.s32.totalorder %s3653_s22, %s4578_s23  ;;  %p4584_p4 = scmp.lt.s32.totalorder %s4578_s23, %s4578_s23 }
 0x341   :  { %3590 = vmatprep.subr.bf16.mxu1 %v4405_v43 }
 0x342   :  { %3624 = vmatpush2.bf16.msra.mxu0 %v4439_v44  ;;  %p4585_p5 = por %p4584_p4, %p4583_p3 }
 0x343   :  { %3625 = vmatprep.subr.bf16.mxu0 %v4444_v45 }
 0x344   :  { %3591 = vmatpush2.bf16.msra.mxu1 %v4403_v47  ;;  %p4586_p6 = pnand %p4585_p5, %p4579_p2 }
 0x346   :  { %3626 = vmatpush2.bf16.msra.mxu0 %v4442_v49 }
 0x347   :  { %v2544_v55 = vpop.f32.mrf.mxu1  ;;  %3627 = vmatprep.subr.bf16.mxu0 %v4447_v53 }
 0x348   :  { %v2545_v57 = vadd.f32 %v2544_v55, %v1045_v50  ;;  %v2585_v58 = vpop.f32.mrf.mxu0 }
 0x349   :  { %v2546_v59 = vpop.f32.mrf.mxu1 }
 0x34a   :  { %v2586_v60 = vadd.f32 %v2585_v58, %v2545_v57  ;;  %v2547_v61 = vadd.f32 %v2546_v59, %v1049_v52  ;;  %v2587_v62 = vpop.f32.mrf.mxu0  ;;  %3628 = vmatpush2.bf16.msra.mxu0 %v4445_v54 }
 0x34b   :  { %v2548_v0 = vpop.f32.mrf.mxu1  ;;  %3629 = vmatprep.subr.bf16.mxu0 %v4450_v56 }
 0x34c   :  { %v2678_v2 = vmul.f32 0.2, %v2586_v60  ;;  %v2588_v3 = vadd.f32 %v2587_v62, %v2547_v61  ;;  %v2589_v5 = vpop.f32.mrf.mxu0 }
 0x34d   :  { %v2549_v6 = vpop.f32.mrf.mxu1 }
 0x34e   :  { %v2679_v7 = vmul.f32 0.2, %v2588_v3  ;;  %v2590_v8 = vpop.f32.mrf.mxu0  ;;  %3630 = vmatpush2.bf16.msra.mxu0 %v4448_v63  ;;  %v2686_v12 = vmax.f32 %v2586_v60, %v2678_v2 }
 0x34f   :  { %3631 = vmatprep.subr.bf16.mxu0 %v4453_v1 }
 0x350   :  { %v2687_v13 = vmax.f32 %v2588_v3, %v2679_v7  ;;  %v2694_v15 = vpack.c.bf16 %v2686_v12, %v2686_v12 }
 0x352   :  { %v2695_v14 = vpack.c.bf16 %v2687_v13, %v2687_v13  ;;  %3632 = vmatpush2.bf16.msra.mxu0 %v4451_v11 }
 0x354   :  { %3592 = vmatprep.mubr.bf16.mxu1 %v2695_v14 }
 0x355   :  { %3593 = vmatmul.mubr.bf16.vlgmr.msra.gmra.mxu1 %v2694_v15 }
 0x387   :  { %v2626_v20 = vpop.f32.mrf.mxu1 }
 0x388   :  { %v2627_v23 = vadd.f32 %v2626_v20, %v1053_v17  ;;  %v2667_v19 = vpop.f32.mrf.mxu0 }
 0x389   :  { %v2628_v9 = vpop.f32.mrf.mxu1 }
 0x38a   :  { %v2668_v24 = vadd.f32 %v2667_v19, %v2627_v23  ;;  %v2629_v21 = vadd.f32 %v2628_v9, %v1057_v22  ;;  %v2669_v25 = vpop.f32.mrf.mxu0 }
 0x38b   :  { %v2630_v26 = vpop.f32.mrf.mxu1 }
 0x38c   :  { %v2680_v10 = vmul.f32 0.2, %v2668_v24  ;;  %v2670_v29 = vadd.f32 %v2669_v25, %v2629_v21  ;;  %v2671_v31 = vpop.f32.mrf.mxu0 }
 0x38d   :  { %v2631_v32 = vpop.f32.mrf.mxu1 }
 0x38e   :  { %v2681_v33 = vmul.f32 0.2, %v2670_v29  ;;  %v2672_v34 = vpop.f32.mrf.mxu0  ;;  %v2688_v35 = vmax.f32 %v2668_v24, %v2680_v10 }
 0x390   :  { %v2689_v27 = vmax.f32 %v2670_v29, %v2681_v33  ;;  %v2696_v37 = vpack.c.bf16 %v2688_v35, %v2688_v35 }
 0x392   :  { %v2697_v36 = vpack.c.bf16 %v2689_v27, %v2689_v27 }
 0x394   :  { %3633 = vmatprep.mubr.bf16.mxu0 %v2697_v36 }
 0x395   :  { %3634 = vmatmul.mubr.bf16.vlgmr.msra.gmra.mxu0 %v2696_v37 }
 0x3c7   :  { %v3512_v4 = vpop.f32.mrf.mxu1 }
 0x3c8   :  { %v3513_v43 = vadd.f32 %v3512_v4, %v2831_v42 }
 0x3c9   :  { %v3514_v38 = vpop.f32.mrf.mxu1 }
 0x3ca   :  { %v3515_v45 = vadd.f32 %v3514_v38, %v2835_v51 }
 0x3cb   :  { %v3516_v39 = vpop.f32.mrf.mxu1 }
 0x3cd   :  { %v3517_v41 = vpop.f32.mrf.mxu1 }
 0x3d5   :  { %v3553_v44 = vpop.f32.mrf.mxu0 }
 0x3d6   :  { %v3554_v46 = vadd.f32 %v3553_v44, %v3513_v43 }
 0x3d7   :  { %v3555_v47 = vpop.f32.mrf.mxu0 }
 0x3d8   :  { %v3556_v48 = vadd.f32 %v3555_v47, %v3515_v45 }
 0x3d9   :  { %v3557_v49 = vpop.f32.mrf.mxu0 }
 0x3db   :  { %v3558_v53 = vpop.f32.mrf.mxu0 }
 0x415   :  { %v3594_v50 = vpop.f32.mrf.mxu1 }
 0x416   :  { %v3595_v56 = vadd.f32 %v3594_v50, %v3554_v46 }
 0x417   :  { %v3596_v52 = vpop.f32.mrf.mxu1 }
 0x418   :  { %v3597_v58 = vadd.f32 %v3596_v52, %v3556_v48 }
 0x419   :  { %v3598_v54 = vpop.f32.mrf.mxu1 }
 0x41b   :  { %v3599_v55 = vpop.f32.mrf.mxu1 }
 0x455   :  { %v3635_v57 = vpop.f32.mrf.mxu0 }
 0x456   :  { %v3636_v59 = vadd.f32 %v3635_v57, %v3595_v56 }
 0x457   :  { %v3637_v60 = vpop.f32.mrf.mxu0 }
 0x458   :  { %4454 = vtanh.f32 %v3636_v59  ;;  %v3638_v28 = vadd.f32 %v3637_v60, %v3597_v58 }
 0x459   :  { %v3639_v30 = vpop.f32.mrf.mxu0 }
 0x45a   :  { %4456 = vtanh.f32 %v3638_v28 }
 0x45b   :  { %v3640_v61 = vpop.f32.mrf.mxu0 }
 0x465   :  { %v4455_v62 = vpop.eup %4454 }
 0x466   :  { %3644 = vst [vmem:[#allocation13] sm:$0xff] %v4455_v62 }
 0x467   :  { %v4457_v63 = vpop.eup %4456 }
 0x468   :  { %3645 = vst [vmem:[#allocation13 + $0x8] sm:$0xff] %v4457_v63 }
 0x469   :  { %4589 = shalt.err (!%p4586_p6)
}
 0x46a   :  { %3655 = dma.vmem_to_hbm [thread:$0]  %s3653_s22, 256, %s4787_s9, [#allocation4]  }
 0x46b   :  { %4606 = dma.done.wait [#allocation4], 256  }
 0x46c   :  { %4607 = vsyncadd [#allocation4], 4294967040 }
 0x46d   :  { %3659 = vsyncpa [#allocation3], 1 }
 0x46e   :  { %3660 = vsyncpa [#allocation6], 1 }
 0x46f   :  { %3661 = vsyncpa [#allocation9], 1 }
 0x470   :  { %3662 = vsyncpa [#allocation12], 1 }
 0x471   :  { %3663 = vsyncpa [#allocation4], 1 }

</bundles_post_ra>
